<compile_context>
chip_gen: v6e
topology: v6e:2x2x1
jax: 0.10.0
libtpu: 0.0.40
codegen_flags: <defaults>
</compile_context>

<pallas_src>
import functools

import jax
import jax.numpy as jnp
from jax.experimental import pallas as pl
from jax.experimental.pallas import tpu as pltpu


def _round_up(a, b):
    return ((a + b - 1) // b) * b


# ----------------------------------------------------------------------------
# Kernels
# ----------------------------------------------------------------------------
def _conv3x3_bn_lrelu_kernel(xflat_ref, w_ref, scale_ref, bias_ref, o_ref,
                             *, TH, W, Wp8, Cout):
    """Fused 3x3 'same' conv (bf16 MXU) + folded BatchNorm + LeakyReLU(0.1).

    xflat_ref : (1, (H+2)*Wp8, Cin) bf16  zero-padded image, rows flattened
    w_ref     : (3, 3, Cin, Cout)   bf16  conv weights (HWIO)
    scale_ref : (1, Cout)           f32   gamma / sqrt(running_var + eps)
    bias_ref  : (1, Cout)           f32   beta - running_mean * scale
    o_ref     : (1, TH, W, Cout)    bf16  TH output rows per grid step
    """
    hb = pl.program_id(1)
    M = TH * Wp8                               # MXU M dim for this step

    # One f32 accumulator per horizontal tap (dw); the per-tap column shift is
    # applied at the end with a single XLU roll instead of 9 misaligned slices.
    accs = [None, None, None]
    for dh in range(3):
        row0 = pl.multiple_of((hb * TH + dh) * Wp8, 8)    # sublane-aligned
        slab = xflat_ref[0, pl.ds(row0, M)]               # (M, Cin) bf16
        for dw in range(3):
            part = jnp.dot(slab, w_ref[dh, dw],
                           preferred_element_type=jnp.float32)
            accs[dw] = part if accs[dw] is None else accs[dw] + part

    acc = (accs[0]
           + pltpu.roll(accs[1], shift=M - 1, axis=0)     # tap dw=1 -> shift -1
           + pltpu.roll(accs[2], shift=M - 2, axis=0))    # tap dw=2 -> shift -2

    y = acc * scale_ref[...] + bias_ref[...]              # folded BN (f32)
    y = jnp.where(y > 0.0, y, 0.1 * y)                    # LeakyReLU(0.1)
    y = y.reshape(TH, Wp8, Cout)[:, :W, :]                # drop padding columns
    o_ref[0] = y.astype(o_ref.dtype)


def _dense_bias_kernel(x_ref, w_ref, b_ref, o_ref):
    """1x1 conv == matmul over channels, with bias, no activation."""
    o_ref[...] = (jnp.dot(x_ref[...], w_ref[...],
                          preferred_element_type=jnp.float32) + b_ref[...])


# ----------------------------------------------------------------------------
# Pallas wrappers
# ----------------------------------------------------------------------------
def conv3x3_bn_lrelu(x, w, scale, bias, target_m=512):
    """x: (N, H, W, Cin) bf16 NHWC -> (N, H, W, Cout) bf16."""
    N, H, W, Cin = x.shape
    Cout = w.shape[-1]
    Wp8 = _round_up(W + 2, 8)                 # padded width, sublane-aligned

    # TODO(synk): 'same' zero-padding (and the 2x2 maxpool) stay in plain JAX
    # glue rather than being fused into the Pallas pipeline.
    xpad = jnp.pad(x, ((0, 0), (1, 1), (1, Wp8 - (W + 1)), (0, 0)))
    xflat = xpad.reshape(N, (H + 2) * Wp8, Cin)

    # Rows per grid step: biggest divisor of H keeping the MXU M dim <= target.
    TH = 1
    for cand in range(1, H + 1):
        if H % cand == 0 and cand * Wp8 <= target_m:
            TH = cand

    kernel = functools.partial(_conv3x3_bn_lrelu_kernel,
                               TH=TH, W=W, Wp8=Wp8, Cout=Cout)

    return pl.pallas_call(
        kernel,
        out_shape=jax.ShapeDtypeStruct((N, H, W, Cout), jnp.bfloat16),
        grid_spec=pltpu.PrefetchScalarGridSpec(
            num_scalar_prefetch=0,
            grid=(N, H // TH),
            in_specs=[
                pl.BlockSpec((1, (H + 2) * Wp8, Cin), lambda n, hb: (n, 0, 0)),
                pl.BlockSpec((3, 3, Cin, Cout), lambda n, hb: (0, 0, 0, 0)),
                pl.BlockSpec((1, Cout), lambda n, hb: (0, 0)),
                pl.BlockSpec((1, Cout), lambda n, hb: (0, 0)),
            ],
            out_specs=pl.BlockSpec((1, TH, W, Cout),
                                   lambda n, hb: (n, hb, 0, 0)),
        ),
        compiler_params=pltpu.CompilerParams(
            dimension_semantics=("parallel", "parallel"),   # v7x megacore
            vmem_limit_bytes=48 * 1024 * 1024,              # fits v7x 64 MiB
        ),
    )(xflat, w, scale, bias)


def conv1x1_bias(x2d, w, b):
    """x2d: (M, Cin) bf16, w: (Cin, Cout) bf16, b: (1, Cout) f32 -> (M, Cout) f32."""
    M, Cin = x2d.shape
    Cout = w.shape[1]

    # Lane-dense output stores: pad Cout up to a multiple of 128.
    Cout_p = _round_up(Cout, 128)
    if Cout_p != Cout:
        w = jnp.pad(w, ((0, 0), (0, Cout_p - Cout)))
        b = jnp.pad(b, ((0, 0), (0, Cout_p - Cout)))

    TM = min(256, _round_up(M, 8))
    Mp = _round_up(M, TM)
    if Mp != M:
        x2d = jnp.pad(x2d, ((0, Mp - M), (0, 0)))

    y = pl.pallas_call(
        _dense_bias_kernel,
        out_shape=jax.ShapeDtypeStruct((Mp, Cout_p), jnp.float32),
        grid_spec=pltpu.PrefetchScalarGridSpec(
            num_scalar_prefetch=0,
            grid=(Mp // TM,),
            in_specs=[
                pl.BlockSpec((TM, Cin), lambda i: (i, 0)),
                pl.BlockSpec((Cin, Cout_p), lambda i: (0, 0)),
                pl.BlockSpec((1, Cout_p), lambda i: (0, 0)),
            ],
            out_specs=pl.BlockSpec((TM, Cout_p), lambda i: (i, 0)),
        ),
        compiler_params=pltpu.CompilerParams(
            dimension_semantics=("parallel",),
        ),
    )(x2d, w, b)
    return y[:M, :Cout]


# ----------------------------------------------------------------------------
# Glue (layout / pooling / parameter setup stays in plain JAX)
# ----------------------------------------------------------------------------
def maxpool2x2(x):
    # TODO(synk): 2x2 max-pool kept in plain JAX glue (cheap reduce); not fused
    # into the Pallas conv kernel.
    N, H, W, C = x.shape
    return jnp.max(x.reshape(N, H // 2, 2, W // 2, 2, C), axis=(2, 4))


# (pool_before_conv, Cin, Cout) for layer0..layer7; 'M_' (layer6) is identity.
_DARKNET19_CFG = [
    (False, 3, 16),      # layer0
    (True, 16, 32),      # layer1: 'M' + conv
    (True, 32, 64),      # layer2
    (True, 64, 128),     # layer3
    (True, 128, 256),    # layer4
    (True, 256, 512),    # layer5
    (False, 512, 1024),  # layer6: 'M_' (1x1/1 pool = identity) + conv
    (False, 1024, 512),  # layer7
]
_NUM_ANCHORS = 5
_NUM_CLASSES = 20
_OUT_CHANNELS = _NUM_ANCHORS * (_NUM_CLASSES + 5)  # 125


def init_params(key):
    eps = 1e-5
    convs = []
    for (pool, cin, cout) in _DARKNET19_CFG:
        key, k1, k2, k3, k4, k5 = jax.random.split(key, 6)
        fan_in = cin * 9
        w = jax.random.normal(k1, (3, 3, cin, cout), jnp.float32) / (fan_in ** 0.5)
        gamma = 1.0 + 0.1 * jax.random.normal(k2, (cout,), jnp.float32)
        beta = 0.1 * jax.random.normal(k3, (cout,), jnp.float32)
        rmean = 0.1 * jax.random.normal(k4, (cout,), jnp.float32)
        rvar = 1.0 + 0.1 * jax.random.uniform(k5, (cout,), jnp.float32)
        scale = gamma / jnp.sqrt(rvar + eps)          # folded BN (eval stats)
        bias = beta - rmean * scale
        convs.append((pool, w.astype(jnp.bfloat16),
                      scale.reshape(1, cout), bias.reshape(1, cout)))

    key, k1, k2 = jax.random.split(key, 3)
    w_o = (jax.random.normal(k1, (512, _OUT_CHANNELS), jnp.float32)
           / (512.0 ** 0.5)).astype(jnp.bfloat16)
    b_o = 0.01 * jax.random.normal(k2, (1, _OUT_CHANNELS), jnp.float32)
    return {"convs": convs, "out": (w_o, b_o)}


def darknet19_forward(im_data, params):
    """im_data: (N, 3, H, W) NCHW float32 -> (N, 125, H/32, W/32) NCHW float32."""
    x = jnp.transpose(im_data, (0, 2, 3, 1)).astype(jnp.bfloat16)  # -> NHWC bf16
    for (pool, w, scale, bias) in params["convs"]:
        if pool:
            x = maxpool2x2(x)
        x = conv3x3_bn_lrelu(x, w, scale, bias)

    # output0: Conv2d(512, 125, k=1, s=1, relu=False, bias=True)
    N, H, W, Cin = x.shape
    w_o, b_o = params["out"]
    y = conv1x1_bias(x.reshape(N * H * W, Cin), w_o, b_o)
    y = y.reshape(N, H, W, _OUT_CHANNELS)
    return jnp.transpose(y, (0, 3, 1, 2))  # back to NCHW, f32


# ----------------------------------------------------------------------------
if __name__ == "__main__":
    key = jax.random.PRNGKey(0)
    kx, kp = jax.random.split(key)

    # Small input consistent with the module: NCHW, 3 channels, 64x64 spatial
    # (5 stride-2 max-pools -> 2x2 feature map at the head).
    im_data = jax.random.normal(kx, (2, 3, 64, 64), dtype=jnp.float32)
    params = init_params(kp)

    out = darknet19_forward(im_data, params)
    out = jax.block_until_ready(out)

    assert out.shape == (2, _OUT_CHANNELS, 2, 2), out.shape
    assert out.dtype == jnp.float32
    assert bool(jnp.all(jnp.isfinite(out)))
    print("KERNEL_OK")
</pallas_src>

<mosaic_0001>
module attributes {stable_mosaic.version = 11 : i64} {
  func.func @_conv3x3_bn_lrelu_kernel(%arg0: i32, %arg1: i32, %arg2: memref<1x4752x3xbf16, #tpu.memory_space<vmem>>, %arg3: memref<3x3x3x16xbf16, #tpu.memory_space<vmem>>, %arg4: memref<1x16xf32, #tpu.memory_space<vmem>>, %arg5: memref<1x16xf32, #tpu.memory_space<vmem>>, %arg6: memref<1x4x64x16xbf16, #tpu.memory_space<vmem>>) attributes {dimension_semantics = [#tpu.dimension_semantics<parallel>, #tpu.dimension_semantics<parallel>], iteration_bounds = array<i64: 2, 16>, scalar_prefetch = 0 : i64, scratch_operands = 0 : i64, tpu.core_type = #tpu.core_type<tc>, window_params = [{transform_indices = @transform_0, window_bounds = array<i64: 1, 4752, 3>}, {pipeline_mode = #tpu.pipeline_mode<synchronous>, transform_indices = @transform_1, window_bounds = array<i64: 3, 3, 3, 16>}, {pipeline_mode = #tpu.pipeline_mode<synchronous>, transform_indices = @transform_2, window_bounds = array<i64: 1, 16>}, {pipeline_mode = #tpu.pipeline_mode<synchronous>, transform_indices = @transform_3, window_bounds = array<i64: 1, 16>}, {transform_indices = @transform_4, window_bounds = array<i64: 1, 4, 64, 16>}]} {
    %c4_i32 = arith.constant 4 : i32
    %0 = arith.muli %arg1, %c4_i32 : i32
    %c0_i32 = arith.constant 0 : i32
    %1 = arith.addi %0, %c0_i32 : i32
    %c72_i32 = arith.constant 72 : i32
    %2 = arith.muli %1, %c72_i32 : i32
    %3 = tpu.assume_multiple %2, 8 : i32
    %c0 = arith.constant 0 : index
    %4 = arith.index_cast %3 : i32 to index
    %c0_0 = arith.constant 0 : index
    %5 = vector.load %arg2[%c0, %4, %c0_0] : memref<1x4752x3xbf16, #tpu.memory_space<vmem>>, vector<1x288x3xbf16>
    %6 = vector.shape_cast %5 : vector<1x288x3xbf16> to vector<288x3xbf16>
    %c0_1 = arith.constant 0 : index
    %c0_2 = arith.constant 0 : index
    %c0_3 = arith.constant 0 : index
    %c0_4 = arith.constant 0 : index
    %7 = vector.load %arg3[%c0_1, %c0_2, %c0_3, %c0_4] : memref<3x3x3x16xbf16, #tpu.memory_space<vmem>>, vector<1x1x3x16xbf16>
    %8 = vector.shape_cast %7 : vector<1x1x3x16xbf16> to vector<3x16xbf16>
    %cst = arith.constant dense<0.000000e+00> : vector<288x16xf32>
    %9 = tpu.matmul %6, %8, %cst {dimension_numbers = #tpu.dot_dimension_numbers<[1], [0], [0], [1], [0, 0, 1, 1], [], []>} : vector<288x3xbf16>, vector<3x16xbf16>, vector<288x16xf32> -> vector<288x16xf32>
    %c0_5 = arith.constant 0 : index
    %c1 = arith.constant 1 : index
    %c0_6 = arith.constant 0 : index
    %c0_7 = arith.constant 0 : index
    %10 = vector.load %arg3[%c0_5, %c1, %c0_6, %c0_7] : memref<3x3x3x16xbf16, #tpu.memory_space<vmem>>, vector<1x1x3x16xbf16>
    %11 = vector.shape_cast %10 : vector<1x1x3x16xbf16> to vector<3x16xbf16>
    %cst_8 = arith.constant dense<0.000000e+00> : vector<288x16xf32>
    %12 = tpu.matmul %6, %11, %cst_8 {dimension_numbers = #tpu.dot_dimension_numbers<[1], [0], [0], [1], [0, 0, 1, 1], [], []>} : vector<288x3xbf16>, vector<3x16xbf16>, vector<288x16xf32> -> vector<288x16xf32>
    %c0_9 = arith.constant 0 : index
    %c2 = arith.constant 2 : index
    %c0_10 = arith.constant 0 : index
    %c0_11 = arith.constant 0 : index
    %13 = vector.load %arg3[%c0_9, %c2, %c0_10, %c0_11] : memref<3x3x3x16xbf16, #tpu.memory_space<vmem>>, vector<1x1x3x16xbf16>
    %14 = vector.shape_cast %13 : vector<1x1x3x16xbf16> to vector<3x16xbf16>
    %cst_12 = arith.constant dense<0.000000e+00> : vector<288x16xf32>
    %15 = tpu.matmul %6, %14, %cst_12 {dimension_numbers = #tpu.dot_dimension_numbers<[1], [0], [0], [1], [0, 0, 1, 1], [], []>} : vector<288x3xbf16>, vector<3x16xbf16>, vector<288x16xf32> -> vector<288x16xf32>
    %c4_i32_13 = arith.constant 4 : i32
    %16 = arith.muli %arg1, %c4_i32_13 : i32
    %c1_i32 = arith.constant 1 : i32
    %17 = arith.addi %16, %c1_i32 : i32
    %c72_i32_14 = arith.constant 72 : i32
    %18 = arith.muli %17, %c72_i32_14 : i32
    %19 = tpu.assume_multiple %18, 8 : i32
    %c0_15 = arith.constant 0 : index
    %20 = arith.index_cast %19 : i32 to index
    %c0_16 = arith.constant 0 : index
    %21 = vector.load %arg2[%c0_15, %20, %c0_16] : memref<1x4752x3xbf16, #tpu.memory_space<vmem>>, vector<1x288x3xbf16>
    %22 = vector.shape_cast %21 : vector<1x288x3xbf16> to vector<288x3xbf16>
    %c1_17 = arith.constant 1 : index
    %c0_18 = arith.constant 0 : index
    %c0_19 = arith.constant 0 : index
    %c0_20 = arith.constant 0 : index
    %23 = vector.load %arg3[%c1_17, %c0_18, %c0_19, %c0_20] : memref<3x3x3x16xbf16, #tpu.memory_space<vmem>>, vector<1x1x3x16xbf16>
    %24 = vector.shape_cast %23 : vector<1x1x3x16xbf16> to vector<3x16xbf16>
    %cst_21 = arith.constant dense<0.000000e+00> : vector<288x16xf32>
    %25 = tpu.matmul %22, %24, %cst_21 {dimension_numbers = #tpu.dot_dimension_numbers<[1], [0], [0], [1], [0, 0, 1, 1], [], []>} : vector<288x3xbf16>, vector<3x16xbf16>, vector<288x16xf32> -> vector<288x16xf32>
    %26 = arith.addf %9, %25 : vector<288x16xf32>
    %c1_22 = arith.constant 1 : index
    %c1_23 = arith.constant 1 : index
    %c0_24 = arith.constant 0 : index
    %c0_25 = arith.constant 0 : index
    %27 = vector.load %arg3[%c1_22, %c1_23, %c0_24, %c0_25] : memref<3x3x3x16xbf16, #tpu.memory_space<vmem>>, vector<1x1x3x16xbf16>
    %28 = vector.shape_cast %27 : vector<1x1x3x16xbf16> to vector<3x16xbf16>
    %cst_26 = arith.constant dense<0.000000e+00> : vector<288x16xf32>
    %29 = tpu.matmul %22, %28, %cst_26 {dimension_numbers = #tpu.dot_dimension_numbers<[1], [0], [0], [1], [0, 0, 1, 1], [], []>} : vector<288x3xbf16>, vector<3x16xbf16>, vector<288x16xf32> -> vector<288x16xf32>
    %30 = arith.addf %12, %29 : vector<288x16xf32>
    %c1_27 = arith.constant 1 : index
    %c2_28 = arith.constant 2 : index
    %c0_29 = arith.constant 0 : index
    %c0_30 = arith.constant 0 : index
    %31 = vector.load %arg3[%c1_27, %c2_28, %c0_29, %c0_30] : memref<3x3x3x16xbf16, #tpu.memory_space<vmem>>, vector<1x1x3x16xbf16>
    %32 = vector.shape_cast %31 : vector<1x1x3x16xbf16> to vector<3x16xbf16>
    %cst_31 = arith.constant dense<0.000000e+00> : vector<288x16xf32>
    %33 = tpu.matmul %22, %32, %cst_31 {dimension_numbers = #tpu.dot_dimension_numbers<[1], [0], [0], [1], [0, 0, 1, 1], [], []>} : vector<288x3xbf16>, vector<3x16xbf16>, vector<288x16xf32> -> vector<288x16xf32>
    %34 = arith.addf %15, %33 : vector<288x16xf32>
    %c4_i32_32 = arith.constant 4 : i32
    %35 = arith.muli %arg1, %c4_i32_32 : i32
    %c2_i32 = arith.constant 2 : i32
    %36 = arith.addi %35, %c2_i32 : i32
    %c72_i32_33 = arith.constant 72 : i32
    %37 = arith.muli %36, %c72_i32_33 : i32
    %38 = tpu.assume_multiple %37, 8 : i32
    %c0_34 = arith.constant 0 : index
    %39 = arith.index_cast %38 : i32 to index
    %c0_35 = arith.constant 0 : index
    %40 = vector.load %arg2[%c0_34, %39, %c0_35] : memref<1x4752x3xbf16, #tpu.memory_space<vmem>>, vector<1x288x3xbf16>
    %41 = vector.shape_cast %40 : vector<1x288x3xbf16> to vector<288x3xbf16>
    %c2_36 = arith.constant 2 : index
    %c0_37 = arith.constant 0 : index
    %c0_38 = arith.constant 0 : index
    %c0_39 = arith.constant 0 : index
    %42 = vector.load %arg3[%c2_36, %c0_37, %c0_38, %c0_39] : memref<3x3x3x16xbf16, #tpu.memory_space<vmem>>, vector<1x1x3x16xbf16>
    %43 = vector.shape_cast %42 : vector<1x1x3x16xbf16> to vector<3x16xbf16>
    %cst_40 = arith.constant dense<0.000000e+00> : vector<288x16xf32>
    %44 = tpu.matmul %41, %43, %cst_40 {dimension_numbers = #tpu.dot_dimension_numbers<[1], [0], [0], [1], [0, 0, 1, 1], [], []>} : vector<288x3xbf16>, vector<3x16xbf16>, vector<288x16xf32> -> vector<288x16xf32>
    %45 = arith.addf %26, %44 : vector<288x16xf32>
    %c2_41 = arith.constant 2 : index
    %c1_42 = arith.constant 1 : index
    %c0_43 = arith.constant 0 : index
    %c0_44 = arith.constant 0 : index
    %46 = vector.load %arg3[%c2_41, %c1_42, %c0_43, %c0_44] : memref<3x3x3x16xbf16, #tpu.memory_space<vmem>>, vector<1x1x3x16xbf16>
    %47 = vector.shape_cast %46 : vector<1x1x3x16xbf16> to vector<3x16xbf16>
    %cst_45 = arith.constant dense<0.000000e+00> : vector<288x16xf32>
    %48 = tpu.matmul %41, %47, %cst_45 {dimension_numbers = #tpu.dot_dimension_numbers<[1], [0], [0], [1], [0, 0, 1, 1], [], []>} : vector<288x3xbf16>, vector<3x16xbf16>, vector<288x16xf32> -> vector<288x16xf32>
    %49 = arith.addf %30, %48 : vector<288x16xf32>
    %c2_46 = arith.constant 2 : index
    %c2_47 = arith.constant 2 : index
    %c0_48 = arith.constant 0 : index
    %c0_49 = arith.constant 0 : index
    %50 = vector.load %arg3[%c2_46, %c2_47, %c0_48, %c0_49] : memref<3x3x3x16xbf16, #tpu.memory_space<vmem>>, vector<1x1x3x16xbf16>
    %51 = vector.shape_cast %50 : vector<1x1x3x16xbf16> to vector<3x16xbf16>
    %cst_50 = arith.constant dense<0.000000e+00> : vector<288x16xf32>
    %52 = tpu.matmul %41, %51, %cst_50 {dimension_numbers = #tpu.dot_dimension_numbers<[1], [0], [0], [1], [0, 0, 1, 1], [], []>} : vector<288x3xbf16>, vector<3x16xbf16>, vector<288x16xf32> -> vector<288x16xf32>
    %53 = arith.addf %34, %52 : vector<288x16xf32>
    %c287_i32 = arith.constant 287 : i32
    %54 = tpu.dynamic_rotate %49 by %c287_i32 dim 0 : vector<288x16xf32>, i32 -> vector<288x16xf32>
    %55 = arith.addf %45, %54 : vector<288x16xf32>
    %c286_i32 = arith.constant 286 : i32
    %56 = tpu.dynamic_rotate %53 by %c286_i32 dim 0 : vector<288x16xf32>, i32 -> vector<288x16xf32>
    %57 = arith.addf %55, %56 : vector<288x16xf32>
    %c0_51 = arith.constant 0 : index
    %c0_52 = arith.constant 0 : index
    %58 = vector.load %arg4[%c0_51, %c0_52] : memref<1x16xf32, #tpu.memory_space<vmem>>, vector<1x16xf32>
    %59 = vector.broadcast %58 : vector<1x16xf32> to vector<288x16xf32>
    %60 = arith.mulf %57, %59 : vector<288x16xf32>
    %c0_53 = arith.constant 0 : index
    %c0_54 = arith.constant 0 : index
    %61 = vector.load %arg5[%c0_53, %c0_54] : memref<1x16xf32, #tpu.memory_space<vmem>>, vector<1x16xf32>
    %62 = vector.broadcast %61 : vector<1x16xf32> to vector<288x16xf32>
    %63 = arith.addf %60, %62 : vector<288x16xf32>
    %cst_55 = arith.constant 0.000000e+00 : f32
    %64 = vector.broadcast %cst_55 : f32 to vector<288x16xf32>
    %65 = arith.cmpf ogt, %63, %64 : vector<288x16xf32>
    %cst_56 = arith.constant 1.000000e-01 : f32
    %66 = vector.broadcast %cst_56 : f32 to vector<288x16xf32>
    %67 = arith.mulf %66, %63 : vector<288x16xf32>
    %68 = arith.select %65, %63, %67 : vector<288x16xi1>, vector<288x16xf32>
    %69 = vector.shape_cast %68 : vector<288x16xf32> to vector<4x72x16xf32>
    %70 = vector.extract_strided_slice %69 {offsets = [0, 0, 0], sizes = [4, 64, 16], strides = [1, 1, 1]} : vector<4x72x16xf32> to vector<4x64x16xf32>
    %71 = arith.truncf %70 : vector<4x64x16xf32> to vector<4x64x16xbf16>
    %c0_57 = arith.constant 0 : index
    %c0_58 = arith.constant 0 : index
    %c0_59 = arith.constant 0 : index
    %c0_60 = arith.constant 0 : index
    %72 = vector.load %arg6[%c0_57, %c0_58, %c0_59, %c0_60] : memref<1x4x64x16xbf16, #tpu.memory_space<vmem>>, vector<1x4x64x16xbf16>
    %73 = vector.shape_cast %72 : vector<1x4x64x16xbf16> to vector<4x64x16xbf16>
    %74 = vector.shape_cast %71 : vector<4x64x16xbf16> to vector<1x4x64x16xbf16>
    tpu.vector_store %arg6[%c0_57, %c0_58, %c0_59, %c0_60], %74 {strides = array<i32>} : memref<1x4x64x16xbf16, #tpu.memory_space<vmem>>, vector<1x4x64x16xbf16>,
    return
  }
  func.func @transform_0(%arg0: i32, %arg1: i32) -> (i32, i32, i32) {
    %c0_i32 = arith.constant 0 : i32
    %c0_i32_0 = arith.constant 0 : i32
    %c0_i32_1 = arith.constant 0 : i32
    return %arg0, %c0_i32, %c0_i32_0 : i32, i32, i32
  }
  func.func @transform_1(%arg0: i32, %arg1: i32) -> (i32, i32, i32, i32) {
    %c0_i32 = arith.constant 0 : i32
    %c0_i32_0 = arith.constant 0 : i32
    %c0_i32_1 = arith.constant 0 : i32
    %c0_i32_2 = arith.constant 0 : i32
    %c0_i32_3 = arith.constant 0 : i32
    return %c0_i32, %c0_i32_0, %c0_i32_1, %c0_i32_2 : i32, i32, i32, i32
  }
  func.func @transform_2(%arg0: i32, %arg1: i32) -> (i32, i32) {
    %c0_i32 = arith.constant 0 : i32
    %c0_i32_0 = arith.constant 0 : i32
    %c0_i32_1 = arith.constant 0 : i32
    return %c0_i32, %c0_i32_0 : i32, i32
  }
  func.func @transform_3(%arg0: i32, %arg1: i32) -> (i32, i32) {
    %c0_i32 = arith.constant 0 : i32
    %c0_i32_0 = arith.constant 0 : i32
    %c0_i32_1 = arith.constant 0 : i32
    return %c0_i32, %c0_i32_0 : i32, i32
  }
  func.func @transform_4(%arg0: i32, %arg1: i32) -> (i32, i32, i32, i32) {
    %c0_i32 = arith.constant 0 : i32
    %c0_i32_0 = arith.constant 0 : i32
    %c0_i32_1 = arith.constant 0 : i32
    return %arg0, %arg1, %c0_i32, %c0_i32_0 : i32, i32, i32, i32
  }
}

</mosaic_0001>

<bundles_post_ra>
// kernel: tpu_custom_call.1
= control target key start
LH: loop header
LB: loop body
LE: loop exit
PB: predicated region body
PF: predicated region fallthrough
CT: control target
= control target key end

     0   :  { %s4134_s15 = smov 0   ;;  %s4136_s16 = smov 0   ;;  %s5936_s0 = inlined_call_operand.vmem [shape: bf16[2,4752,3], index: 0, kind: input, shape index: {}]   ;;  %s5937_s1 = inlined_call_operand.vmem [shape: bf16[3,3,3,16], index: 1, kind: input, shape index: {}]   ;;  %s5938_s2 = inlined_call_operand.vmem [shape: f32[1,16], index: 2, kind: input, shape index: {}]   ;;  %s5939_s3 = inlined_call_operand.vmem [shape: f32[1,16], index: 3, kind: input, shape index: {}]   ;;  %s5940_s4 = inlined_call_operand.vmem [shape: bf16[2,64,64,16], index: 4, kind: output, shape index: {}]  }
   0x1   :  { %s4138_s17 = smov 0   ;;  %s4140_s18 = smov 0  }
   0x2   :  { %s4142_s19 = smov 0  }
   0x3 LB: > { %s23_s20 = sadd.s32 1, %s4098_s17  ;;  %s26_s21 = sadd.s32 1, %s4102_s18  ;;  %s4106_s19 = sphi %s4142_s19, %s14_s19   ;;  %s4102_s18 = sphi %s4140_s18, %s6138_s18   ;;  %s4098_s17 = sphi %s4138_s17, %s6137_s17   ;;  %s4094_s16 = sphi %s4136_s16, %s6136_s16   ;;  %s4090_s15 = sphi %s4134_s15, %s6135_s15  }
   0x4   : > { %p24_p0 = scmp.ge.s32.totalorder %s23_s20, 16  ;;  %p3155_p1 = scmp.ge.s32.totalorder %s4106_s19, 1 }
   0x5   : > { %p176_p2 = scmp.lt.s32.totalorder %s4106_s19, 33 }
   0x6   : > { %s6140_s20 = smov (%p24_p0, %s23_s20), 0  ;;  %s6142_s21 = smov (!%p24_p0, %s26_s21), %s4102_s18 }
   0x7   : > { %p177_p3 = pnand %p3155_p1, %p176_p2  ;;  %p28_p4 = scmp.ge.s32.totalorder %s6142_s21, 2 }
   0x9   : > { %s6144_s21 = smov (%p28_p4, %s6142_s21), 0  ;;  %180 = sbr.rel (%p177_p3) target bundleno = 598 (0x256), region = 36 }
   0xe   : > { %v3166_v0 = vld [vmem:[%s5937_s1 + $0x6] sm:$0x3]  ;;  %vm460_vm0 = vcmask 1040384   ;;  %vm461_vm1 = vcmask 1041408   ;;  %p207_p5 = scmp.lt.s32.totalorder %s4094_s16, 1  ;;  %v4108_v1 = vmov 65535  }
   0xf   : > { %v462_v2 = vsel %vm460_vm0, 4294967295, %v4108_v1  ;;  %s4170_s24 = sshll.u32 %s4090_s15, 2  ;;  %v3239_v3 = vld [vmem:[%s5937_s1 + $0x8] sm:$0x3]  ;;  %s224_s27 = smul.u32 288, %s4090_s15  ;;  %vm405_vm2 = vcmask 23552  }
  0x10   : > { %v4176_v4 = vsel %vm461_vm1, %v462_v2, 0  ;;  %s6146_s16 = smov (!%p207_p5, %s4094_s16), 1  ;;  %v265_v5 = vld [vmem:[%s5937_s1] sm:$0x3]  ;;  %s271_s30 = sadd.s32 1, %s4170_s24  ;;  %vm3022_vm5 = vcmask 125952  }
  0x11   : > { %v465_v6 = vand.u32 %v3166_v0, %v4176_v4  ;;  %v963_v7 = vand.u32 %v3239_v3, %v4176_v4  ;;  %v785_v8 = vand.u32 %v4176_v4, %v265_v5  ;;  %s225_s5 = sshra.s32 %s224_s27, 3  ;;  %s3972_s6 = smul.u32 2376, %s6146_s16  ;;  %v3162_v9 = vld [vmem:[%s5937_s1 + $0x2] sm:$0x3]  ;;  %v3276_v10 = vld [vmem:[%s5937_s1 + $0xa] sm:$0x3] }
  0x12   : > { %s3161_s7 = sshll.u32 %s225_s5, 2  ;;  %s272_s8 = smul.u32 72, %s271_s30  ;;  %v1143_v15 = vand.u32 %v3162_v9, %v4176_v4  ;;  %v1325_v17 = vand.u32 %v3276_v10, %v4176_v4  ;;  %v3163_v31 = vld [vmem:[%s5937_s1 + $0x4] sm:$0x3]  ;;  %v3314_v36 = vld [vmem:[%s5937_s1 + $0xc] sm:$0x3] }
  0x13   : > { %3628 = vmatprep.subr.bf16.mxu0 %v465_v6  ;;  %3970 = vmatprep.subr.bf16.mxu1 %v465_v6  ;;  %s4191_s11 = scalar_lea.vmem %s5936_s0, %s3972_s6  ;;  %v4310_v35 = vand.u32 %v3163_v31, %v4176_v4  ;;  %v4331_v39 = vand.u32 %v3314_v36, %v4176_v4  ;;  %s1684_s5 = sadd.s32 2, %s4170_s24  ;;  %v3351_v53 = vld [vmem:[%s5937_s1 + $0xe] sm:$0x3]  ;;  %v3370_v55 = vld [vmem:[%s5937_s1 + $0x10] sm:$0x3] }
  0x14   : > { %3629 = vmatpush3.bf16.msra.mxu0 %v465_v6  ;;  %3971 = vmatpush3.bf16.msra.mxu1 %v465_v6  ;;  %s273_s12 = sshra.s32 %s272_s8, 3  ;;  %s4194_s13 = scalar_lea.vmem %s4191_s11, %s3161_s7  ;;  %v2083_v54 = vand.u32 %v3351_v53, %v4176_v4  ;;  %v2301_v56 = vand.u32 %v3370_v55, %v4176_v4 }
  0x15   : > { %3704 = vmatprep.subr.bf16.mxu0 %v963_v7  ;;  %3666 = vmatprep.subr.bf16.mxu1 %v785_v8  ;;  %s3165_s14 = sshll.u32 %s273_s12, 2  ;;  %v4287_v30 = vld [vmem:[%s4194_s13] sm:$0xff]   ;;  %v4304_v33 = vld [vmem:[%s4194_s13 + $0x8] sm:$0xff]   ;;  %v4307_v34 = vld [vmem:[%s4194_s13 + $0x10] sm:$0xff]   ;;  %s1685_s6 = smul.u32 72, %s1684_s5 }
  0x16   : > { %s4200_s23 = scalar_lea.vmem %s4191_s11, %s3165_s14  ;;  %v4325_v37 = vld [vmem:[%s4194_s13 + $0x18] sm:$0xff]   ;;  %v4328_v38 = vld [vmem:[%s4194_s13 + $0x20] sm:$0xff]   ;;  %v4343_v40 = vld [vmem:[%s4194_s13 + $0x28] sm:$0xff]   ;;  %p215_p6 = scmp.lt.s32.totalorder %s4170_s24, 63 }
  0x17   : > { %v4206_v11 = vld [vmem:[%s4200_s23] sm:$0xff]   ;;  %v4209_v12 = vld [vmem:[%s4200_s23 + $0x50] sm:$0xff]   ;;  %v4214_v13 = vld [vmem:[%s4200_s23 + $0x8] sm:$0xff]   ;;  %s1686_s7 = sshra.s32 %s1685_s6, 3  ;;  %s3159_s15 = sshll.u32 %s6146_s16, 9 }
  0x18   : > { %3630 = vmatprep.mubr.msk.bf16.mxu0 %vm405_vm2, %v4206_v11  ;;  %3650 = vmatprep.mubr.msk.bf16.mxu1 %vm405_vm2, %v4209_v12  ;;  %v4219_v14 = vld [vmem:[%s4200_s23 + $0x58] sm:$0xff]   ;;  %v4225_v16 = vld [vmem:[%s4200_s23 + $0x10] sm:$0xff]   ;;  %v4231_v18 = vld [vmem:[%s4200_s23 + $0x60] sm:$0xff]   ;;  %s3313_s8 = sshll.u32 %s1686_s7, 2  ;;  %s6148_s24 = smov (!%p215_p6, %s4170_s24), 63 }
  0x19   : > { %3631 = vmatmul.mubr.msk.bf16.vlgmr.msra.gmra.mxu0 %vm405_vm2, %v4214_v13  ;;  %3651 = vmatmul.mubr.msk.bf16.vlgmr.msra.gmra.mxu1 %vm405_vm2, %v4219_v14  ;;  %v4238_v19 = vld [vmem:[%s4200_s23 + $0x18] sm:$0xff]   ;;  %v4241_v20 = vld [vmem:[%s4200_s23 + $0x68] sm:$0xff]   ;;  %v4244_v21 = vld [vmem:[%s4200_s23 + $0x20] sm:$0xff]   ;;  %s4361_s9 = scalar_lea.vmem %s4191_s11, %s3313_s8  ;;  %s3158_s14 = sshll.u32 %s6148_s24, 3 }
  0x1a   : > { %3705 = vmatpush3.bf16.msra.mxu0 %v963_v7  ;;  %3667 = vmatpush3.bf16.msra.mxu1 %v785_v8  ;;  %v4247_v22 = vld [vmem:[%s4200_s23 + $0x70] sm:$0xff]   ;;  %v4258_v23 = vld [vmem:[%s4200_s23 + $0x28] sm:$0xff]   ;;  %v4261_v24 = vld [vmem:[%s4200_s23 + $0x78] sm:$0xff]   ;;  %s5397_s25 = sadd.s32 %s3159_s15, %s3158_s14 }
  0x1b   : > { %3634 = vmatprep.mubr.msk.bf16.mxu0 %vm405_vm2, %v4225_v16  ;;  %3654 = vmatprep.mubr.msk.bf16.mxu1 %vm405_vm2, %v4231_v18  ;;  %v4264_v25 = vld [vmem:[%s4200_s23 + $0x30] sm:$0xff]   ;;  %v4267_v26 = vld [vmem:[%s4200_s23 + $0x80] sm:$0xff]   ;;  %v4278_v27 = vld [vmem:[%s4200_s23 + $0x38] sm:$0xff]   ;;  %s3160_s26 = sshll.u32 %s5397_s25, 2 }
  0x1c   : > { %3742 = vmatprep.subr.bf16.mxu1 %v1143_v15  ;;  %3780 = vmatprep.subr.bf16.mxu0 %v1325_v17  ;;  %v4281_v28 = vld [vmem:[%s4200_s23 + $0x88] sm:$0xff]   ;;  %v4284_v29 = vld [vmem:[%s4200_s23 + $0x40] sm:$0xff]   ;;  %v4346_v41 = vld [vmem:[%s4194_s13 + $0x30] sm:$0xff]   ;;  %s5431_s29 = scalar_lea.vmem %s5940_s4, %s3160_s26 }
  0x1d   : > { %v4301_v32 = vld [vmem:[%s4200_s23 + $0x48] sm:$0xff]   ;;  %v4358_v42 = vld [vmem:[%s4194_s13 + $0x38] sm:$0xff]   ;;  %v4364_v43 = vld [vmem:[%s4194_s13 + $0x40] sm:$0xff]  }
  0x1e   : > { %v4375_v44 = vld [vmem:[%s4194_s13 + $0x48] sm:$0xff]   ;;  %v4378_v45 = vld [vmem:[%s4194_s13 + $0x50] sm:$0xff]   ;;  %v4389_v46 = vld [vmem:[%s4194_s13 + $0x58] sm:$0xff]  }
  0x1f   : > { %v4392_v47 = vld [vmem:[%s4194_s13 + $0x60] sm:$0xff]   ;;  %v4403_v48 = vld [vmem:[%s4194_s13 + $0x68] sm:$0xff]   ;;  %v4406_v49 = vld [vmem:[%s4194_s13 + $0x70] sm:$0xff]  }
  0x20   : > { %v4417_v50 = vld [vmem:[%s4194_s13 + $0x78] sm:$0xff]   ;;  %v4420_v51 = vld [vmem:[%s4194_s13 + $0x80] sm:$0xff]   ;;  %v4431_v52 = vld [vmem:[%s4194_s13 + $0x88] sm:$0xff]  }
  0x21   : > { %3635 = vmatmul.mubr.msk.bf16.gmra.mxu0 %vm405_vm2, %v4238_v19  ;;  %3655 = vmatmul.mubr.msk.bf16.gmra.mxu1 %vm405_vm2, %v4241_v20  ;;  %v4524_v57 = vld [vmem:[%s4361_s9] sm:$0xff]   ;;  %v4535_v58 = vld [vmem:[%s4361_s9 + $0x8] sm:$0xff]   ;;  %v4538_v59 = vld [vmem:[%s4361_s9 + $0x10] sm:$0xff]  }
  0x22   : > { %3638 = vmatprep.mubr.msk.bf16.mxu0 %vm405_vm2, %v4244_v21  ;;  %3658 = vmatprep.mubr.msk.bf16.mxu1 %vm405_vm2, %v4247_v22  ;;  %v4549_v60 = vld [vmem:[%s4361_s9 + $0x18] sm:$0xff]   ;;  %v4552_v61 = vld [vmem:[%s4361_s9 + $0x20] sm:$0xff]   ;;  %v4567_v3 = vld [vmem:[%s4361_s9 + $0x28] sm:$0xff]  }
  0x23   : > { %v4572_v5 = vld [vmem:[%s4361_s9 + $0x30] sm:$0xff]  }
  0x29   : > { %3639 = vmatmul.mubr.msk.bf16.gmra.mxu0 %vm405_vm2, %v4258_v23  ;;  %3659 = vmatmul.mubr.msk.bf16.gmra.mxu1 %vm405_vm2, %v4261_v24 }
  0x2a   : > { %3642 = vmatprep.mubr.msk.bf16.mxu0 %vm405_vm2, %v4264_v25  ;;  %3662 = vmatprep.mubr.msk.bf16.mxu1 %vm405_vm2, %v4267_v26 }
  0x31   : > { %3643 = vmatmul.mubr.msk.bf16.gmra.mxu0 %vm405_vm2, %v4278_v27  ;;  %3663 = vmatmul.mubr.msk.bf16.gmra.mxu1 %vm405_vm2, %v4281_v28 }
  0x32   : > { %3646 = vmatprep.mubr.msk.bf16.mxu0 %vm405_vm2, %v4284_v29  ;;  %3668 = vmatprep.mubr.msk.bf16.mxu1 %vm405_vm2, %v4287_v30 }
  0x39   : > { %3647 = vmatmul.mubr.msk.bf16.gmra.mxu0 %vm405_vm2, %v4301_v32  ;;  %3669 = vmatmul.mubr.msk.bf16.vlgmr.msra.gmra.mxu1 %vm405_vm2, %v4304_v33 }
  0x3a   : > { %3706 = vmatprep.mubr.msk.bf16.mxu0 %vm405_vm2, %v4206_v11  ;;  %3743 = vmatpush3.bf16.msra.mxu1 %v1143_v15  ;;  %v4598_v15 = vld [vmem:[%s4361_s9 + $0x40] sm:$0xff]  }
  0x3b   : > { %3672 = vmatprep.mubr.msk.bf16.mxu1 %vm405_vm2, %v4307_v34  ;;  %3818 = vmatprep.subr.bf16.mxu1 %v4310_v35 }
  0x41   : > { %3707 = vmatmul.mubr.msk.bf16.vlgmr.msra.gmra.mxu0 %vm405_vm2, %v4214_v13  ;;  %3673 = vmatmul.mubr.msk.bf16.gmra.mxu1 %vm405_vm2, %v4325_v37 }
  0x42   : > { %3781 = vmatpush3.bf16.msra.mxu0 %v1325_v17  ;;  %3676 = vmatprep.mubr.msk.bf16.mxu1 %vm405_vm2, %v4328_v38 }
  0x43   : > { %3710 = vmatprep.mubr.msk.bf16.mxu0 %vm405_vm2, %v4225_v16  ;;  %3856 = vmatprep.subr.bf16.mxu0 %v4331_v39 }
  0x49   : > { %3711 = vmatmul.mubr.msk.bf16.gmra.mxu0 %vm405_vm2, %v4238_v19  ;;  %3677 = vmatmul.mubr.msk.bf16.gmra.mxu1 %vm405_vm2, %v4343_v40 }
  0x4a   : > { %3714 = vmatprep.mubr.msk.bf16.mxu0 %vm405_vm2, %v4244_v21  ;;  %3680 = vmatprep.mubr.msk.bf16.mxu1 %vm405_vm2, %v4346_v41 }
  0x51   : > { %3715 = vmatmul.mubr.msk.bf16.gmra.mxu0 %vm405_vm2, %v4258_v23  ;;  %3681 = vmatmul.mubr.msk.bf16.gmra.mxu1 %vm405_vm2, %v4358_v42 }
  0x52   : > { %3718 = vmatprep.mubr.msk.bf16.mxu0 %vm405_vm2, %v4264_v25  ;;  %3684 = vmatprep.mubr.msk.bf16.mxu1 %vm405_vm2, %v4364_v43 }
  0x59   : > { %3719 = vmatmul.mubr.msk.bf16.gmra.mxu0 %vm405_vm2, %v4278_v27  ;;  %3685 = vmatmul.mubr.msk.bf16.gmra.mxu1 %vm405_vm2, %v4375_v44 }
  0x5a   : > { %3722 = vmatprep.mubr.msk.bf16.mxu0 %vm405_vm2, %v4284_v29  ;;  %3688 = vmatprep.mubr.msk.bf16.mxu1 %vm405_vm2, %v4378_v45 }
  0x61   : > { %3723 = vmatmul.mubr.msk.bf16.gmra.mxu0 %vm405_vm2, %v4301_v32  ;;  %3689 = vmatmul.mubr.msk.bf16.gmra.mxu1 %vm405_vm2, %v4389_v46 }
  0x62   : > { %3726 = vmatprep.mubr.msk.bf16.mxu0 %vm405_vm2, %v4209_v12  ;;  %3692 = vmatprep.mubr.msk.bf16.mxu1 %vm405_vm2, %v4392_v47 }
  0x69   : > { %3727 = vmatmul.mubr.msk.bf16.gmra.mxu0 %vm405_vm2, %v4219_v14  ;;  %3693 = vmatmul.mubr.msk.bf16.gmra.mxu1 %vm405_vm2, %v4403_v48 }
  0x6a   : > { %3730 = vmatprep.mubr.msk.bf16.mxu0 %vm405_vm2, %v4231_v18  ;;  %3696 = vmatprep.mubr.msk.bf16.mxu1 %vm405_vm2, %v4406_v49 }
  0x71   : > { %3731 = vmatmul.mubr.msk.bf16.gmra.mxu0 %vm405_vm2, %v4241_v20  ;;  %3697 = vmatmul.mubr.msk.bf16.gmra.mxu1 %vm405_vm2, %v4417_v50 }
  0x72   : > { %3734 = vmatprep.mubr.msk.bf16.mxu0 %vm405_vm2, %v4247_v22  ;;  %3700 = vmatprep.mubr.msk.bf16.mxu1 %vm405_vm2, %v4420_v51 }
  0x79   : > { %3735 = vmatmul.mubr.msk.bf16.gmra.mxu0 %vm405_vm2, %v4261_v24  ;;  %3701 = vmatmul.mubr.msk.bf16.gmra.mxu1 %vm405_vm2, %v4431_v52 }
  0x7a   : > { %3738 = vmatprep.mubr.msk.bf16.mxu0 %vm405_vm2, %v4267_v26  ;;  %3744 = vmatprep.mubr.msk.bf16.mxu1 %vm405_vm2, %v4287_v30 }
  0x81   : > { %3739 = vmatmul.mubr.msk.bf16.gmra.mxu0 %vm405_vm2, %v4281_v28  ;;  %3745 = vmatmul.mubr.msk.bf16.vlgmr.msra.gmra.mxu1 %vm405_vm2, %v4304_v33 }
  0x82   : > { %3782 = vmatprep.mubr.msk.bf16.mxu0 %vm405_vm2, %v4206_v11  ;;  %3819 = vmatpush3.bf16.msra.mxu1 %v4310_v35  ;;  %v4654_v35 = vld [vmem:[%s4361_s9 + $0x60] sm:$0xff]  }
  0x83   : > { %3748 = vmatprep.mubr.msk.bf16.mxu1 %vm405_vm2, %v4307_v34  ;;  %3894 = vmatprep.subr.bf16.mxu1 %v2083_v54 }
  0x89   : > { %3783 = vmatmul.mubr.msk.bf16.vlgmr.msra.gmra.mxu0 %vm405_vm2, %v4214_v13  ;;  %3749 = vmatmul.mubr.msk.bf16.gmra.mxu1 %vm405_vm2, %v4325_v37  ;;  %v4593_v13 = vld [vmem:[%s4361_s9 + $0x38] sm:$0xff]  }
  0x8a   : > { %3857 = vmatpush3.bf16.msra.mxu0 %v4331_v39  ;;  %3752 = vmatprep.mubr.msk.bf16.mxu1 %vm405_vm2, %v4328_v38 }
  0x8b   : > { %3786 = vmatprep.mubr.msk.bf16.mxu0 %vm405_vm2, %v4225_v16  ;;  %3932 = vmatprep.subr.bf16.mxu0 %v2301_v56 }
  0x91   : > { %3787 = vmatmul.mubr.msk.bf16.gmra.mxu0 %vm405_vm2, %v4238_v19  ;;  %3753 = vmatmul.mubr.msk.bf16.gmra.mxu1 %vm405_vm2, %v4343_v40 }
  0x92   : > { %3790 = vmatprep.mubr.msk.bf16.mxu0 %vm405_vm2, %v4244_v21  ;;  %3756 = vmatprep.mubr.msk.bf16.mxu1 %vm405_vm2, %v4346_v41 }
  0x99   : > { %3791 = vmatmul.mubr.msk.bf16.gmra.mxu0 %vm405_vm2, %v4258_v23  ;;  %3757 = vmatmul.mubr.msk.bf16.gmra.mxu1 %vm405_vm2, %v4358_v42  ;;  %v4621_v23 = vld [vmem:[%s4361_s9 + $0x48] sm:$0xff]  }
  0x9a   : > { %3794 = vmatprep.mubr.msk.bf16.mxu0 %vm405_vm2, %v4264_v25  ;;  %3760 = vmatprep.mubr.msk.bf16.mxu1 %vm405_vm2, %v4364_v43  ;;  %v4626_v25 = vld [vmem:[%s4361_s9 + $0x50] sm:$0xff]  }
  0xa1   : > { %3795 = vmatmul.mubr.msk.bf16.gmra.mxu0 %vm405_vm2, %v4278_v27  ;;  %3761 = vmatmul.mubr.msk.bf16.gmra.mxu1 %vm405_vm2, %v4375_v44 }
  0xa2   : > { %3798 = vmatprep.mubr.msk.bf16.mxu0 %vm405_vm2, %v4284_v29  ;;  %3764 = vmatprep.mubr.msk.bf16.mxu1 %vm405_vm2, %v4378_v45 }
  0xa9   : > { %3799 = vmatmul.mubr.msk.bf16.gmra.mxu0 %vm405_vm2, %v4301_v32  ;;  %3765 = vmatmul.mubr.msk.bf16.gmra.mxu1 %vm405_vm2, %v4389_v46 }
  0xaa   : > { %3802 = vmatprep.mubr.msk.bf16.mxu0 %vm405_vm2, %v4209_v12  ;;  %3768 = vmatprep.mubr.msk.bf16.mxu1 %vm405_vm2, %v4392_v47 }
  0xb1   : > { %3803 = vmatmul.mubr.msk.bf16.gmra.mxu0 %vm405_vm2, %v4219_v14  ;;  %3769 = vmatmul.mubr.msk.bf16.gmra.mxu1 %vm405_vm2, %v4403_v48 }
  0xb2   : > { %3806 = vmatprep.mubr.msk.bf16.mxu0 %vm405_vm2, %v4231_v18  ;;  %3772 = vmatprep.mubr.msk.bf16.mxu1 %vm405_vm2, %v4406_v49 }
  0xb9   : > { %3807 = vmatmul.mubr.msk.bf16.gmra.mxu0 %vm405_vm2, %v4241_v20  ;;  %3773 = vmatmul.mubr.msk.bf16.gmra.mxu1 %vm405_vm2, %v4417_v50 }
  0xba   : > { %3810 = vmatprep.mubr.msk.bf16.mxu0 %vm405_vm2, %v4247_v22  ;;  %3776 = vmatprep.mubr.msk.bf16.mxu1 %vm405_vm2, %v4420_v51 }
  0xc1   : > { %3811 = vmatmul.mubr.msk.bf16.gmra.mxu0 %vm405_vm2, %v4261_v24  ;;  %3777 = vmatmul.mubr.msk.bf16.gmra.mxu1 %vm405_vm2, %v4431_v52 }
  0xc2   : > { %3814 = vmatprep.mubr.msk.bf16.mxu0 %vm405_vm2, %v4267_v26  ;;  %3820 = vmatprep.mubr.msk.bf16.mxu1 %vm405_vm2, %v4287_v30 }
  0xc9   : > { %3815 = vmatmul.mubr.msk.bf16.gmra.mxu0 %vm405_vm2, %v4281_v28  ;;  %3821 = vmatmul.mubr.msk.bf16.vlgmr.msra.gmra.mxu1 %vm405_vm2, %v4304_v33  ;;  %v4651_v33 = vld [vmem:[%s4361_s9 + $0x58] sm:$0xff]  }
  0xca   : > { %3858 = vmatprep.mubr.msk.bf16.mxu0 %vm405_vm2, %v4524_v57  ;;  %3895 = vmatpush3.bf16.msra.mxu1 %v2083_v54 }
  0xcb   : > { %3824 = vmatprep.mubr.msk.bf16.mxu1 %vm405_vm2, %v4307_v34 }
  0xd1   : > { %3859 = vmatmul.mubr.msk.bf16.vlgmr.msra.gmra.mxu0 %vm405_vm2, %v4535_v58  ;;  %3825 = vmatmul.mubr.msk.bf16.gmra.mxu1 %vm405_vm2, %v4325_v37 }
  0xd2   : > { %3933 = vmatpush3.bf16.msra.mxu0 %v2301_v56  ;;  %3828 = vmatprep.mubr.msk.bf16.mxu1 %vm405_vm2, %v4328_v38 }
  0xd3   : > { %3862 = vmatprep.mubr.msk.bf16.mxu0 %vm405_vm2, %v4538_v59 }
  0xd9   : > { %v3632_v62 = vpop.f32.mrf.mxu0  ;;  %3863 = vmatmul.mubr.msk.bf16.gmra.mxu0 %vm405_vm2, %v4549_v60  ;;  %v4556_v63 = vpop.f32.mrf.mxu1  ;;  %3829 = vmatmul.mubr.msk.bf16.gmra.mxu1 %vm405_vm2, %v4343_v40 }
  0xda   : > { %5943 = vst [vmem:[#allocation2_spill] sm:$0xff] %v4556_v63  ;;  %3866 = vmatprep.mubr.msk.bf16.mxu0 %vm405_vm2, %v4552_v61  ;;  %3832 = vmatprep.mubr.msk.bf16.mxu1 %vm405_vm2, %v4346_v41 }
  0xdb   : > { %v501_v0 = vpop.f32.mrf.mxu0  ;;  %v4564_v1 = vpop.f32.mrf.mxu1 }
  0xdc   : > { %5944 = vst [vmem:[#allocation3_spill] sm:$0xff] %v4564_v1 }
  0xdd   : > { %v3633_v2 = vpop.f32.mrf.mxu0  ;;  %v4569_v4 = vpop.f32.mrf.mxu1 }
  0xde   : > { %5945 = vst [vmem:[#allocation4_spill] sm:$0xff] %v4569_v4 }
  0xdf   : > { %v504_v6 = vpop.f32.mrf.mxu0  ;;  %v4574_v7 = vpop.f32.mrf.mxu1 }
  0xe0   : > { %5946 = vst [vmem:[#allocation5_spill] sm:$0xff] %v4574_v7 }
  0xe1   : > { %v4576_v8 = vpop.f32.mrf.mxu0  ;;  %3867 = vmatmul.mubr.msk.bf16.gmra.mxu0 %vm405_vm2, %v4567_v3  ;;  %v3656_v9 = vpop.f32.mrf.mxu1  ;;  %3833 = vmatmul.mubr.msk.bf16.gmra.mxu1 %vm405_vm2, %v4358_v42 }
  0xe2   : > { %3870 = vmatprep.mubr.msk.bf16.mxu0 %vm405_vm2, %v4572_v5  ;;  %3836 = vmatprep.mubr.msk.bf16.mxu1 %vm405_vm2, %v4364_v43 }
  0xe3   : > { %v4584_v10 = vpop.f32.mrf.mxu0  ;;  %v4588_v11 = vpop.f32.mrf.mxu1 }
  0xe4   : > { %5947 = vst [vmem:[#allocation6_spill] sm:$0xff] %v4588_v11 }
  0xe5   : > { %v4590_v12 = vpop.f32.mrf.mxu0  ;;  %v4595_v14 = vpop.f32.mrf.mxu1 }
  0xe6   : > { %5948 = vst [vmem:[#allocation7_spill] sm:$0xff] %v4595_v14 }
  0xe7   : > { %v4600_v16 = vpop.f32.mrf.mxu0  ;;  %v4602_v17 = vpop.f32.mrf.mxu1 }
  0xe8   : > { %5949 = vst [vmem:[#allocation8_spill] sm:$0xff] %v4602_v17 }
  0xe9   : > { %v4604_v18 = vpop.f32.mrf.mxu0  ;;  %3871 = vmatmul.mubr.msk.bf16.gmra.mxu0 %vm405_vm2, %v4593_v13  ;;  %v4608_v19 = vpop.f32.mrf.mxu1  ;;  %3837 = vmatmul.mubr.msk.bf16.gmra.mxu1 %vm405_vm2, %v4375_v44 }
  0xea   : > { %5950 = vst [vmem:[#allocation9_spill] sm:$0xff] %v4608_v19  ;;  %3874 = vmatprep.mubr.msk.bf16.mxu0 %vm405_vm2, %v4598_v15  ;;  %3840 = vmatprep.mubr.msk.bf16.mxu1 %vm405_vm2, %v4378_v45  ;;  %v4679_v45 = vld [vmem:[%s4361_s9 + $0x68] sm:$0xff]  }
  0xeb   : > { %v533_v20 = vpop.f32.mrf.mxu0  ;;  %v4616_v21 = vpop.f32.mrf.mxu1 }
  0xec   : > { %5951 = vst [vmem:[#allocation10_spill] sm:$0xff] %v4616_v21  ;;  %v4709_v20 = vld [vmem:[%s4361_s9 + $0x78] sm:$0xff]  }
  0xed   : > { %v4618_v22 = vpop.f32.mrf.mxu0  ;;  %v4623_v24 = vpop.f32.mrf.mxu1 }
  0xee   : > { %5952 = vst [vmem:[#allocation11_spill] sm:$0xff] %v4623_v24 }
  0xef   : > { %v4628_v26 = vpop.f32.mrf.mxu0  ;;  %v4630_v27 = vpop.f32.mrf.mxu1 }
  0xf0   : > { %5953 = vst [vmem:[#allocation12_spill] sm:$0xff] %v4630_v27 }
  0xf1   : > { %v4632_v28 = vpop.f32.mrf.mxu0  ;;  %3875 = vmatmul.mubr.msk.bf16.gmra.mxu0 %vm405_vm2, %v4621_v23  ;;  %v4636_v29 = vpop.f32.mrf.mxu1  ;;  %3841 = vmatmul.mubr.msk.bf16.gmra.mxu1 %vm405_vm2, %v4389_v46 }
  0xf2   : > { %5954 = vst [vmem:[#allocation13_spill] sm:$0xff] %v4636_v29  ;;  %3878 = vmatprep.mubr.msk.bf16.mxu0 %vm405_vm2, %v4626_v25  ;;  %3844 = vmatprep.mubr.msk.bf16.mxu1 %vm405_vm2, %v4392_v47  ;;  %v4682_v47 = vld [vmem:[%s4361_s9 + $0x70] sm:$0xff]  }
  0xf3   : > { %v4642_v30 = vpop.f32.mrf.mxu0  ;;  %v4646_v31 = vpop.f32.mrf.mxu1 }
  0xf4   : > { %5955 = vst [vmem:[#allocation14_spill] sm:$0xff] %v4646_v31 }
  0xf5   : > { %v4648_v32 = vpop.f32.mrf.mxu0  ;;  %v3665_v34 = vpop.f32.mrf.mxu1 }
  0xf6   : > { %v4712_v34 = vld [vmem:[%s4361_s9 + $0x80] sm:$0xff]  }
  0xf7   : > { %v4656_v36 = vpop.f32.mrf.mxu0  ;;  %v4658_v37 = vpop.f32.mrf.mxu1 }
  0xf8   : > { %5956 = vst [vmem:[#allocation15_spill] sm:$0xff] %v4658_v37 }
  0xf9   : > { %v4660_v38 = vpop.f32.mrf.mxu0  ;;  %3879 = vmatmul.mubr.msk.bf16.gmra.mxu0 %vm405_vm2, %v4651_v33  ;;  %v3670_v39 = vpop.f32.mrf.mxu1  ;;  %3845 = vmatmul.mubr.msk.bf16.gmra.mxu1 %vm405_vm2, %v4403_v48 }
  0xfa   : > { %3882 = vmatprep.mubr.msk.bf16.mxu0 %vm405_vm2, %v4654_v35  ;;  %v4668_v40 = vadd.f32 %v3670_v39, %v3632_v62  ;;  %3848 = vmatprep.mubr.msk.bf16.mxu1 %vm405_vm2, %v4406_v49 }
  0xfb   : > { %v4670_v41 = vpop.f32.mrf.mxu0  ;;  %v821_v42 = vpop.f32.mrf.mxu1 }
  0xfc   : > { %v4674_v43 = vadd.f32 %v821_v42, %v501_v0 }
  0xfd   : > { %v4676_v44 = vpop.f32.mrf.mxu0  ;;  %v3671_v46 = vpop.f32.mrf.mxu1 }
  0xfe   : > { %v4684_v48 = vadd.f32 %v3671_v46, %v3633_v2 }
  0xff   : > { %v567_v53 = vpop.f32.mrf.mxu0  ;;  %v824_v54 = vpop.f32.mrf.mxu1 }
 0x100   : > { %v4686_v55 = vadd.f32 %v824_v54, %v504_v6 }
 0x101   : > { %v4688_v56 = vpop.f32.mrf.mxu0  ;;  %3883 = vmatmul.mubr.msk.bf16.gmra.mxu0 %vm405_vm2, %v4679_v45  ;;  %v3674_v49 = vpop.f32.mrf.mxu1  ;;  %3849 = vmatmul.mubr.msk.bf16.gmra.mxu1 %vm405_vm2, %v4417_v50 }
 0x102   : > { %3886 = vmatprep.mubr.msk.bf16.mxu0 %vm405_vm2, %v4682_v47  ;;  %v4697_v62 = vadd.f32 %v3674_v49, %v4576_v8  ;;  %3852 = vmatprep.mubr.msk.bf16.mxu1 %vm405_vm2, %v4420_v51  ;;  %v4740_v49 = vld [vmem:[%s4361_s9 + $0x88] sm:$0xff]  }
 0x103   : > { %v4699_v0 = vpop.f32.mrf.mxu0  ;;  %v837_v2 = vpop.f32.mrf.mxu1 }
 0x104   : > { %v4704_v6 = vadd.f32 %v837_v2, %v4584_v10 }
 0x105   : > { %v4706_v9 = vpop.f32.mrf.mxu0  ;;  %v3675_v50 = vpop.f32.mrf.mxu1 }
 0x106   : > { %v4715_v8 = vadd.f32 %v3675_v50, %v4590_v12 }
 0x107   : > { %v4717_v39 = vpop.f32.mrf.mxu0  ;;  %v840_v42 = vpop.f32.mrf.mxu1 }
 0x108   : > { %v4720_v51 = vadd.f32 %v840_v42, %v4600_v16 }
 0x109   : > { %v4722_v46 = vpop.f32.mrf.mxu0  ;;  %3887 = vmatmul.mubr.msk.bf16.gmra.mxu0 %vm405_vm2, %v4709_v20  ;;  %v3678_v10 = vpop.f32.mrf.mxu1  ;;  %3853 = vmatmul.mubr.msk.bf16.gmra.mxu1 %vm405_vm2, %v4431_v52 }
 0x10a   : > { %3890 = vmatprep.mubr.msk.bf16.mxu0 %vm405_vm2, %v4712_v34  ;;  %v4731_v12 = vadd.f32 %v3678_v10, %v4604_v18  ;;  %3896 = vmatprep.mubr.msk.bf16.mxu1 %vm405_vm2, %v4524_v57 }
 0x10b   : > { %v4733_v53 = vpop.f32.mrf.mxu0  ;;  %v853_v16 = vpop.f32.mrf.mxu1 }
 0x10d   : > { %v4737_v54 = vpop.f32.mrf.mxu0  ;;  %v3679_v2 = vpop.f32.mrf.mxu1 }
 0x10e   : > { %v4743_v50 = vadd.f32 %v3679_v2, %v4618_v22 }
 0x10f   : > { %v4745_v52 = vpop.f32.mrf.mxu0  ;;  %v855_v42 = vpop.f32.mrf.mxu1 }
 0x110   : > { %v4748_v18 = vadd.f32 %v855_v42, %v4628_v26 }
 0x111   : > { %v4750_v10 = vpop.f32.mrf.mxu0  ;;  %3891 = vmatmul.mubr.msk.bf16.gmra.mxu0 %vm405_vm2, %v4740_v49  ;;  %v3682_v16 = vpop.f32.mrf.mxu1  ;;  %3897 = vmatmul.mubr.msk.bf16.vlgmr.msra.gmra.mxu1 %vm405_vm2, %v4535_v58 }
 0x112   : > { %3934 = vmatprep.mubr.msk.bf16.mxu0 %vm405_vm2, %v4524_v57  ;;  %v4759_v22 = vadd.f32 %v3682_v16, %v4632_v28  ;;  %3900 = vmatprep.mubr.msk.bf16.mxu1 %vm405_vm2, %v4538_v59 }
 0x113   : > { %v4761_v2 = vpop.f32.mrf.mxu0  ;;  %v868_v26 = vpop.f32.mrf.mxu1 }
 0x114   : > { %v4766_v42 = vadd.f32 %v868_v26, %v4642_v30 }
 0x115   : > { %v4768_v37 = vpop.f32.mrf.mxu0  ;;  %v3683_v31 = vpop.f32.mrf.mxu1 }
 0x116   : > { %v4771_v29 = vadd.f32 %v3683_v31, %v4648_v32 }
 0x117   : > { %v4773_v27 = vpop.f32.mrf.mxu0  ;;  %v871_v57 = vpop.f32.mrf.mxu1 }
 0x118   : > { %v4776_v28 = vadd.f32 %v871_v57, %v4656_v36 }
 0x119   : > { %v4778_v16 = vpop.f32.mrf.mxu0  ;;  %3935 = vmatmul.mubr.msk.bf16.vlgmr.msra.gmra.mxu0 %vm405_vm2, %v4535_v58  ;;  %v3686_v24 = vpop.f32.mrf.mxu1  ;;  %3901 = vmatmul.mubr.msk.bf16.gmra.mxu1 %vm405_vm2, %v4549_v60 }
 0x11a   : > { %3938 = vmatprep.mubr.msk.bf16.mxu0 %vm405_vm2, %v4538_v59  ;;  %v4787_v30 = vadd.f32 %v3686_v24, %v4660_v38  ;;  %3904 = vmatprep.mubr.msk.bf16.mxu1 %vm405_vm2, %v4552_v61 }
 0x11b   : > { %v4789_v31 = vpop.f32.mrf.mxu0  ;;  %v884_v32 = vpop.f32.mrf.mxu1 }
 0x11c   : > { %v4794_v36 = vadd.f32 %v884_v32, %v4670_v41 }
 0x11d   : > { %v4796_v58 = vpop.f32.mrf.mxu0  ;;  %v3687_v26 = vpop.f32.mrf.mxu1 }
 0x11e   : > { %5957 = vst [vmem:[#allocation16_spill] sm:$0xff] %v4794_v36  ;;  %v4799_v57 = vadd.f32 %v3687_v26, %v4676_v44 }
 0x11f   : > { %v4801_v21 = vpop.f32.mrf.mxu0  ;;  %v887_v59 = vpop.f32.mrf.mxu1 }
 0x120   : > { %5958 = vst [vmem:[#allocation17_spill] sm:$0xff] %v4799_v57 }
 0x121   : > { %v4803_v24 = vpop.f32.mrf.mxu0  ;;  %3939 = vmatmul.mubr.msk.bf16.gmra.mxu0 %vm405_vm2, %v4549_v60  ;;  %v4807_v38 = vpop.f32.mrf.mxu1  ;;  %3905 = vmatmul.mubr.msk.bf16.gmra.mxu1 %vm405_vm2, %v4567_v3 }
 0x122   : > { %5959 = vst [vmem:[#allocation18_spill] sm:$0xff] %v4807_v38  ;;  %3942 = vmatprep.mubr.msk.bf16.mxu0 %vm405_vm2, %v4552_v61  ;;  %3908 = vmatprep.mubr.msk.bf16.mxu1 %vm405_vm2, %v4572_v5 }
 0x123   : > { %v4813_v41 = vpop.f32.mrf.mxu0  ;;  %v4817_v44 = vpop.f32.mrf.mxu1 }
 0x124   : > { %5960 = vst [vmem:[#allocation19_spill] sm:$0xff] %v4817_v44 }
 0x125   : > { %v4819_v32 = vpop.f32.mrf.mxu0  ;;  %v4821_v26 = vpop.f32.mrf.mxu1 }
 0x126   : > { %5961 = vst [vmem:[#allocation20_spill] sm:$0xff] %v4821_v26 }
 0x127   : > { %v4823_v60 = vpop.f32.mrf.mxu0  ;;  %v4825_v59 = vpop.f32.mrf.mxu1 }
 0x128   : > { %5962 = vst [vmem:[#allocation21_spill] sm:$0xff] %v4825_v59 }
 0x129   : > { %v4827_v19 = vpop.f32.mrf.mxu0  ;;  %3943 = vmatmul.mubr.msk.bf16.gmra.mxu0 %vm405_vm2, %v4567_v3  ;;  %v3694_v61 = vpop.f32.mrf.mxu1  ;;  %3909 = vmatmul.mubr.msk.bf16.gmra.mxu1 %vm405_vm2, %v4593_v13 }
 0x12a   : > { %3946 = vmatprep.mubr.msk.bf16.mxu0 %vm405_vm2, %v4572_v5  ;;  %3912 = vmatprep.mubr.msk.bf16.mxu1 %vm405_vm2, %v4598_v15 }
 0x12b   : > { %v4835_v17 = vpop.f32.mrf.mxu0  ;;  %v4839_v14 = vpop.f32.mrf.mxu1 }
 0x12c   : > { %5963 = vst [vmem:[#allocation22_spill] sm:$0xff] %v4839_v14 }
 0x12d   : > { %v4841_v11 = vpop.f32.mrf.mxu0  ;;  %v4843_v59 = vpop.f32.mrf.mxu1 }
 0x12e   : > { %5964 = vst [vmem:[#allocation23_spill] sm:$0xff] %v4843_v59 }
 0x12f   : > { %v4845_v7 = vpop.f32.mrf.mxu0  ;;  %v4847_v3 = vpop.f32.mrf.mxu1 }
 0x130   : > { %5965 = vst [vmem:[#allocation24_spill] sm:$0xff] %v4847_v3 }
 0x131   : > { %v4849_v61 = vpop.f32.mrf.mxu0  ;;  %3947 = vmatmul.mubr.msk.bf16.gmra.mxu0 %vm405_vm2, %v4593_v13  ;;  %v4853_v5 = vpop.f32.mrf.mxu1  ;;  %3913 = vmatmul.mubr.msk.bf16.gmra.mxu1 %vm405_vm2, %v4621_v23 }
 0x132   : > { %5966 = vst [vmem:[#allocation25_spill] sm:$0xff] %v4853_v5  ;;  %3950 = vmatprep.mubr.msk.bf16.mxu0 %vm405_vm2, %v4598_v15  ;;  %3916 = vmatprep.mubr.msk.bf16.mxu1 %vm405_vm2, %v4626_v25 }
 0x133   : > { %v4859_v14 = vpop.f32.mrf.mxu0  ;;  %v4863_v59 = vpop.f32.mrf.mxu1 }
 0x134   : > { %5967 = vst [vmem:[#allocation26_spill] sm:$0xff] %v4863_v59 }
 0x135   : > { %v4865_v3 = vpop.f32.mrf.mxu0  ;;  %v4867_v26 = vpop.f32.mrf.mxu1 }
 0x136   : > { %5968 = vst [vmem:[#allocation27_spill] sm:$0xff] %v4867_v26 }
 0x137   : > { %v4869_v13 = vpop.f32.mrf.mxu0  ;;  %v4871_v5 = vpop.f32.mrf.mxu1 }
 0x138   : > { %5969 = vst [vmem:[#allocation28_spill] sm:$0xff] %v4871_v5 }
 0x139   : > { %v4873_v4 = vpop.f32.mrf.mxu0  ;;  %3951 = vmatmul.mubr.msk.bf16.gmra.mxu0 %vm405_vm2, %v4621_v23  ;;  %v4877_v15 = vpop.f32.mrf.mxu1  ;;  %3917 = vmatmul.mubr.msk.bf16.gmra.mxu1 %vm405_vm2, %v4651_v33 }
 0x13a   : > { %5970 = vst [vmem:[#allocation29_spill] sm:$0xff] %v4877_v15  ;;  %3954 = vmatprep.mubr.msk.bf16.mxu0 %vm405_vm2, %v4626_v25  ;;  %3920 = vmatprep.mubr.msk.bf16.mxu1 %vm405_vm2, %v4654_v35 }
 0x13b   : > { %v4883_v59 = vpop.f32.mrf.mxu0  ;;  %v4887_v26 = vpop.f32.mrf.mxu1 }
 0x13c   : > { %5971 = vst [vmem:[#allocation30_spill] sm:$0xff] %v4887_v26 }
 0x13d   : > { %v4889_v5 = vpop.f32.mrf.mxu0  ;;  %v3703_v44 = vpop.f32.mrf.mxu1 }
 0x13f   : > { %v4891_v1 = vpop.f32.mrf.mxu0  ;;  %v4893_v23 = vpop.f32.mrf.mxu1 }
 0x140   : > { %5972 = vst [vmem:[#allocation31_spill] sm:$0xff] %v4893_v23 }
 0x141   : > { %v4895_v15 = vpop.f32.mrf.mxu0  ;;  %3955 = vmatmul.mubr.msk.bf16.gmra.mxu0 %vm405_vm2, %v4651_v33  ;;  %v3746_v25 = vpop.f32.mrf.mxu1  ;;  %3921 = vmatmul.mubr.msk.bf16.gmra.mxu1 %vm405_vm2, %v4679_v45 }
 0x142   : > { %3958 = vmatprep.mubr.msk.bf16.mxu0 %vm405_vm2, %v4654_v35  ;;  %v4904_v26 = vadd.f32 %v3746_v25, %v4688_v56  ;;  %3924 = vmatprep.mubr.msk.bf16.mxu1 %vm405_vm2, %v4682_v47 }
 0x143   : > { %v4906_v44 = vpop.f32.mrf.mxu0  ;;  %v1179_v23 = vpop.f32.mrf.mxu1 }
 0x144   : > { %5973 = vst [vmem:[#allocation32_spill] sm:$0xff] %v4904_v26  ;;  %v4911_v38 = vadd.f32 %v1179_v23, %v4699_v0 }
 0x145   : > { %v4913_v33 = vpop.f32.mrf.mxu0  ;;  %v3747_v63 = vpop.f32.mrf.mxu1 }
 0x146   : > { %v4916_v57 = vadd.f32 %v3747_v63, %v4706_v9 }
 0x147   : > { %v4918_v36 = vpop.f32.mrf.mxu0  ;;  %v1182_v35 = vpop.f32.mrf.mxu1 }
 0x148   : > { %v4921_v56 = vadd.f32 %v1182_v35, %v4717_v39 }
 0x149   : > { %v4923_v25 = vpop.f32.mrf.mxu0  ;;  %3959 = vmatmul.mubr.msk.bf16.gmra.mxu0 %vm405_vm2, %v4679_v45  ;;  %v3750_v26 = vpop.f32.mrf.mxu1  ;;  %3925 = vmatmul.mubr.msk.bf16.gmra.mxu1 %vm405_vm2, %v4709_v20 }
 0x14a   : > { %5974 = vst [vmem:[#allocation33_spill] sm:$0xff] %v4921_v56  ;;  %3962 = vmatprep.mubr.msk.bf16.mxu0 %vm405_vm2, %v4682_v47  ;;  %v4932_v63 = vadd.f32 %v3750_v26, %v4722_v46  ;;  %3928 = vmatprep.mubr.msk.bf16.mxu1 %vm405_vm2, %v4712_v34 }
 0x14b   : > { %v4934_v0 = vpop.f32.mrf.mxu0  ;;  %v1195_v9 = vpop.f32.mrf.mxu1 }
 0x14c   : > { %5975 = vst [vmem:[#allocation34_spill] sm:$0xff] %v4932_v63  ;;  %v4939_v39 = vadd.f32 %v1195_v9, %v4733_v53 }
 0x14d   : > { %v4941_v45 = vpop.f32.mrf.mxu0  ;;  %v3751_v23 = vpop.f32.mrf.mxu1 }
 0x14e   : > { %5976 = vst [vmem:[#allocation35_spill] sm:$0xff] %v4939_v39  ;;  %v4944_v35 = vadd.f32 %v3751_v23, %v4737_v54 }
 0x14f   : > { %v4946_v56 = vpop.f32.mrf.mxu0  ;;  %v1198_v47 = vpop.f32.mrf.mxu1 }
 0x150   : > { %5977 = vst [vmem:[#allocation36_spill] sm:$0xff] %v4944_v35  ;;  %v4949_v46 = vadd.f32 %v1198_v47, %v4745_v52 }
 0x151   : > { %v4951_v26 = vpop.f32.mrf.mxu0  ;;  %3963 = vmatmul.mubr.msk.bf16.gmra.mxu0 %vm405_vm2, %v4709_v20  ;;  %v3754_v63 = vpop.f32.mrf.mxu1  ;;  %3929 = vmatmul.mubr.msk.bf16.gmra.mxu1 %vm405_vm2, %v4740_v49 }
 0x152   : > { %5978 = vst [vmem:[#allocation37_spill] sm:$0xff] %v4949_v46  ;;  %3966 = vmatprep.mubr.msk.bf16.mxu0 %vm405_vm2, %v4712_v34  ;;  %v4960_v53 = vadd.f32 %v3754_v63, %v4750_v10 }
 0x153   : > { %v4962_v54 = vpop.f32.mrf.mxu0  ;;  %v1211_v9 = vpop.f32.mrf.mxu1 }
 0x154   : > { %5979 = vst [vmem:[#allocation38_spill] sm:$0xff] %v4960_v53  ;;  %v4965_v52 = vadd.f32 %v1211_v9, %v4761_v2 }
 0x155   : > { %v4967_v23 = vpop.f32.mrf.mxu0  ;;  %v3755_v47 = vpop.f32.mrf.mxu1 }
 0x156   : > { %5980 = vst [vmem:[#allocation39_spill] sm:$0xff] %v4965_v52  ;;  %v4970_v20 = vadd.f32 %v3755_v47, %v4768_v37 }
 0x157   : > { %v4972_v46 = vpop.f32.mrf.mxu0  ;;  %v1214_v35 = vpop.f32.mrf.mxu1 }
 0x158   : > { %5981 = vst [vmem:[#allocation40_spill] sm:$0xff] %v4970_v20  ;;  %v4975_v34 = vadd.f32 %v1214_v35, %v4773_v27 }
 0x159   : > { %v4977_v10 = vpop.f32.mrf.mxu0  ;;  %3967 = vmatmul.mubr.msk.bf16.gmra.mxu0 %vm405_vm2, %v4740_v49  ;;  %v3758_v63 = vpop.f32.mrf.mxu1 }
 0x15a   : > { %5982 = vst [vmem:[#allocation41_spill] sm:$0xff] %v4975_v34  ;;  %v4982_v2 = vadd.f32 %v3758_v63, %v4778_v16 }
 0x15b   : > { %v4984_v9 = vpop.f32.mrf.mxu0  ;;  %v1227_v52 = vpop.f32.mrf.mxu1 }
 0x15c   : > { %5983 = vst [vmem:[#allocation42_spill] sm:$0xff] %v4982_v2  ;;  %v4987_v37 = vadd.f32 %v1227_v52, %v4789_v31 }
 0x15d   : > { %v4989_v47 = vpop.f32.mrf.mxu0  ;;  %v3759_v20 = vpop.f32.mrf.mxu1 }
 0x15e   : > { %5984 = vst [vmem:[#allocation43_spill] sm:$0xff] %v4987_v37  ;;  %v4992_v27 = vadd.f32 %v3759_v20, %v4796_v58 }
 0x15f   : > { %v4994_v35 = vpop.f32.mrf.mxu0  ;;  %v1230_v34 = vpop.f32.mrf.mxu1 }
 0x160   : > { %5985 = vst [vmem:[#allocation44_spill] sm:$0xff] %v4992_v27  ;;  %v4997_v49 = vadd.f32 %v1230_v34, %v4801_v21 }
 0x161   : > { %v4999_v16 = vpop.f32.mrf.mxu0  ;;  %v3762_v63 = vpop.f32.mrf.mxu1 }
 0x162   : > { %5986 = vst [vmem:[#allocation45_spill] sm:$0xff] %v4997_v49  ;;  %v5002_v2 = vadd.f32 %v3762_v63, %v4803_v24 }
 0x163   : > { %v5004_v31 = vpop.f32.mrf.mxu0  ;;  %v1243_v52 = vpop.f32.mrf.mxu1 }
 0x164   : > { %5987 = vst [vmem:[#allocation46_spill] sm:$0xff] %v5002_v2  ;;  %v5007_v37 = vadd.f32 %v1243_v52, %v4813_v41 }
 0x165   : > { %v5009_v58 = vpop.f32.mrf.mxu0  ;;  %v3763_v20 = vpop.f32.mrf.mxu1 }
 0x166   : > { %5988 = vst [vmem:[#allocation47_spill] sm:$0xff] %v5007_v37  ;;  %v5012_v27 = vadd.f32 %v3763_v20, %v4819_v32 }
 0x167   : > { %v5014_v21 = vpop.f32.mrf.mxu0  ;;  %v1246_v34 = vpop.f32.mrf.mxu1 }
 0x168   : > { %5989 = vst [vmem:[#allocation48_spill] sm:$0xff] %v5012_v27  ;;  %v5017_v49 = vadd.f32 %v1246_v34, %v4823_v60 }
 0x169   : > { %v5019_v24 = vpop.f32.mrf.mxu0  ;;  %v3766_v63 = vpop.f32.mrf.mxu1 }
 0x16a   : > { %5990 = vst [vmem:[#allocation49_spill] sm:$0xff] %v5017_v49  ;;  %v5022_v2 = vadd.f32 %v3766_v63, %v4827_v19 }
 0x16b   : > { %v5024_v41 = vpop.f32.mrf.mxu0  ;;  %v1259_v52 = vpop.f32.mrf.mxu1 }
 0x16c   : > { %5991 = vst [vmem:[#allocation50_spill] sm:$0xff] %v5022_v2  ;;  %v5027_v37 = vadd.f32 %v1259_v52, %v4835_v17 }
 0x16d   : > { %v5029_v32 = vpop.f32.mrf.mxu0  ;;  %v3767_v20 = vpop.f32.mrf.mxu1 }
 0x16e   : > { %5992 = vst [vmem:[#allocation51_spill] sm:$0xff] %v5027_v37  ;;  %v5032_v27 = vadd.f32 %v3767_v20, %v4841_v11 }
 0x16f   : > { %v5034_v60 = vpop.f32.mrf.mxu0  ;;  %v1262_v34 = vpop.f32.mrf.mxu1 }
 0x170   : > { %5993 = vst [vmem:[#allocation52_spill] sm:$0xff] %v5032_v27  ;;  %v5037_v49 = vadd.f32 %v1262_v34, %v4845_v7 }
 0x171   : > { %v5039_v19 = vpop.f32.mrf.mxu0  ;;  %v3770_v63 = vpop.f32.mrf.mxu1 }
 0x172   : > { %5994 = vst [vmem:[#allocation53_spill] sm:$0xff] %v5037_v49  ;;  %v5042_v2 = vadd.f32 %v3770_v63, %v4849_v61 }
 0x173   : > { %v5044_v17 = vpop.f32.mrf.mxu0  ;;  %v1275_v52 = vpop.f32.mrf.mxu1 }
 0x174   : > { %5995 = vst [vmem:[#allocation54_spill] sm:$0xff] %v5042_v2  ;;  %v5047_v37 = vadd.f32 %v1275_v52, %v4859_v14 }
 0x175   : > { %v5049_v11 = vpop.f32.mrf.mxu0  ;;  %v3771_v20 = vpop.f32.mrf.mxu1 }
 0x176   : > { %5996 = vst [vmem:[#allocation55_spill] sm:$0xff] %v5047_v37  ;;  %v5052_v27 = vadd.f32 %v3771_v20, %v4865_v3 }
 0x177   : > { %v5054_v7 = vpop.f32.mrf.mxu0  ;;  %v1278_v34 = vpop.f32.mrf.mxu1 }
 0x178   : > { %5997 = vst [vmem:[#allocation56_spill] sm:$0xff] %v5052_v27  ;;  %v5057_v49 = vadd.f32 %v1278_v34, %v4869_v13 }
 0x179   : > { %v5059_v61 = vpop.f32.mrf.mxu0  ;;  %v3774_v63 = vpop.f32.mrf.mxu1 }
 0x17a   : > { %5998 = vst [vmem:[#allocation57_spill] sm:$0xff] %v5057_v49  ;;  %v5062_v2 = vadd.f32 %v3774_v63, %v4873_v4 }
 0x17b   : > { %v5064_v14 = vpop.f32.mrf.mxu0  ;;  %v1291_v52 = vpop.f32.mrf.mxu1 }
 0x17c   : > { %5999 = vst [vmem:[#allocation58_spill] sm:$0xff] %v5062_v2  ;;  %v5067_v37 = vadd.f32 %v1291_v52, %v4883_v59 }
 0x17d   : > { %v5069_v3 = vpop.f32.mrf.mxu0  ;;  %v3775_v20 = vpop.f32.mrf.mxu1 }
 0x17e   : > { %6000 = vst [vmem:[#allocation59_spill] sm:$0xff] %v5067_v37  ;;  %v5072_v27 = vadd.f32 %v3775_v20, %v4889_v5 }
 0x17f   : > { %v5074_v13 = vpop.f32.mrf.mxu0  ;;  %v1294_v34 = vpop.f32.mrf.mxu1 }
 0x180   : > { %6001 = vst [vmem:[#allocation60_spill] sm:$0xff] %v5072_v27  ;;  %v5077_v49 = vadd.f32 %v1294_v34, %v4891_v1 }
 0x181   : > { %v5079_v4 = vpop.f32.mrf.mxu0  ;;  %v3778_v63 = vpop.f32.mrf.mxu1 }
 0x182   : > { %6002 = vst [vmem:[#allocation61_spill] sm:$0xff] %v5077_v49  ;;  %v5082_v2 = vadd.f32 %v3778_v63, %v4895_v15 }
 0x183   : > { %v5084_v59 = vpop.f32.mrf.mxu0  ;;  %v1307_v52 = vpop.f32.mrf.mxu1 }
 0x184   : > { %6003 = vst [vmem:[#allocation62_spill] sm:$0xff] %v5082_v2  ;;  %v5087_v37 = vadd.f32 %v1307_v52, %v4906_v44 }
 0x185   : > { %v5089_v5 = vpop.f32.mrf.mxu0  ;;  %v3779_v20 = vpop.f32.mrf.mxu1 }
 0x186   : > { %6004 = vst [vmem:[#allocation63_spill] sm:$0xff] %v5087_v37  ;;  %v5092_v27 = vadd.f32 %v3779_v20, %v4913_v33 }
 0x187   : > { %v5094_v1 = vpop.f32.mrf.mxu0  ;;  %v1310_v34 = vpop.f32.mrf.mxu1 }
 0x188   : > { %6005 = vst [vmem:[#allocation64_spill] sm:$0xff] %v5092_v27  ;;  %v5097_v49 = vadd.f32 %v1310_v34, %v4918_v36 }
 0x189   : > { %v5099_v15 = vpop.f32.mrf.mxu0  ;;  %v3822_v63 = vpop.f32.mrf.mxu1 }
 0x18a   : > { %6006 = vst [vmem:[#allocation65_spill] sm:$0xff] %v5097_v49  ;;  %v5102_v2 = vadd.f32 %v3822_v63, %v4923_v25 }
 0x18b   : > { %v5104_v44 = vpop.f32.mrf.mxu0  ;;  %v1541_v52 = vpop.f32.mrf.mxu1 }
 0x18c   : > { %v5107_v37 = vadd.f32 %v1541_v52, %v4934_v0 }
 0x18d   : > { %v5109_v33 = vpop.f32.mrf.mxu0  ;;  %v3823_v20 = vpop.f32.mrf.mxu1 }
 0x18e   : > { %6007 = vst [vmem:[#allocation66_spill] sm:$0xff] %v5107_v37  ;;  %v5112_v27 = vadd.f32 %v3823_v20, %v4941_v45 }
 0x18f   : > { %v5114_v36 = vpop.f32.mrf.mxu0  ;;  %v1544_v34 = vpop.f32.mrf.mxu1 }
 0x190   : > { %6008 = vst [vmem:[#allocation67_spill] sm:$0xff] %v5112_v27  ;;  %v5117_v49 = vadd.f32 %v1544_v34, %v4946_v56 }
 0x191   : > { %v3860_v25 = vpop.f32.mrf.mxu0  ;;  %v3826_v63 = vpop.f32.mrf.mxu1 }
 0x192   : > { %v5120_v53 = vadd.f32 %v3860_v25, %v4668_v40  ;;  %v5123_v0 = vadd.f32 %v3826_v63, %v4951_v26 }
 0x193   : > { %v1909_v52 = vpop.f32.mrf.mxu0  ;;  %v1557_v37 = vpop.f32.mrf.mxu1 }
 0x194   : > { %v5126_v39 = vadd.f32 %v1909_v52, %v4674_v43  ;;  %v5129_v45 = vadd.f32 %v1557_v37, %v4962_v54 }
 0x195   : > { %v3861_v20 = vpop.f32.mrf.mxu0  ;;  %v3827_v27 = vpop.f32.mrf.mxu1 }
 0x196   : > { %v5132_v56 = vadd.f32 %v3861_v20, %v4684_v48  ;;  %v5135_v34 = vadd.f32 %v3827_v27, %v4967_v23 }
 0x197   : > { %v1912_v40 = vpop.f32.mrf.mxu0  ;;  %v1560_v25 = vpop.f32.mrf.mxu1 }
 0x198   : > { %v5138_v26 = vadd.f32 %v1912_v40, %v4686_v55  ;;  %v5141_v63 = vadd.f32 %v1560_v25, %v4972_v46 }
 0x199   : > { %v3864_v43 = vpop.f32.mrf.mxu0  ;;  %v3830_v52 = vpop.f32.mrf.mxu1 }
 0x19a   : > { %v5144_v54 = vadd.f32 %v3864_v43, %v4697_v62  ;;  %v5147_v37 = vadd.f32 %v3830_v52, %v4977_v10 }
 0x19b   : > { %v1925_v48 = vpop.f32.mrf.mxu0  ;;  %v1573_v20 = vpop.f32.mrf.mxu1 }
 0x19c   : > { %v5150_v23 = vadd.f32 %v1925_v48, %v4704_v6  ;;  %v5153_v27 = vadd.f32 %v1573_v20, %v4984_v9 }
 0x19d   : > { %v3865_v55 = vpop.f32.mrf.mxu0  ;;  %v3831_v40 = vpop.f32.mrf.mxu1 }
 0x19e   : > { %v5156_v46 = vadd.f32 %v3865_v55, %v4715_v8  ;;  %v5159_v25 = vadd.f32 %v3831_v40, %v4989_v47 }
 0x19f   : > { %v1928_v62 = vpop.f32.mrf.mxu0  ;;  %v1576_v43 = vpop.f32.mrf.mxu1 }
 0x1a0   : > { %6009 = vst [vmem:[#allocation68_spill] sm:$0xff] %v5159_v25  ;;  %v5162_v10 = vadd.f32 %v1928_v62, %v4720_v51  ;;  %v5165_v52 = vadd.f32 %v1576_v43, %v4994_v35 }
 0x1a1   : > { %v3868_v6 = vpop.f32.mrf.mxu0  ;;  %v3834_v48 = vpop.f32.mrf.mxu1 }
 0x1a2   : > { %v5168_v9 = vadd.f32 %v3868_v6, %v4731_v12  ;;  %v5171_v20 = vadd.f32 %v3834_v48, %v4999_v16 }
 0x1a3   : > { %v1941_v8 = vpop.f32.mrf.mxu0  ;;  %v1589_v55 = vpop.f32.mrf.mxu1 }
 0x1a4   : > { %v5174_v47 = vadd.f32 %v1589_v55, %v5004_v31 }
 0x1a5   : > { %v3869_v40 = vpop.f32.mrf.mxu0  ;;  %v3835_v25 = vpop.f32.mrf.mxu1 }
 0x1a6   : > { %v5177_v51 = vadd.f32 %v3869_v40, %v4743_v50  ;;  %v5180_v35 = vadd.f32 %v3835_v25, %v5009_v58 }
 0x1a7   : > { %v1943_v62 = vpop.f32.mrf.mxu0  ;;  %v1592_v43 = vpop.f32.mrf.mxu1 }
 0x1a8   : > { %v5183_v12 = vadd.f32 %v1943_v62, %v4748_v18  ;;  %v5186_v16 = vadd.f32 %v1592_v43, %v5014_v21 }
 0x1a9   : > { %v3872_v6 = vpop.f32.mrf.mxu0  ;;  %v3838_v48 = vpop.f32.mrf.mxu1 }
 0x1aa   : > { %v5189_v31 = vadd.f32 %v3872_v6, %v4759_v22  ;;  %v5192_v8 = vadd.f32 %v3838_v48, %v5019_v24 }
 0x1ab   : > { %v1956_v50 = vpop.f32.mrf.mxu0  ;;  %v1605_v55 = vpop.f32.mrf.mxu1 }
 0x1ac   : > { %v5195_v58 = vadd.f32 %v1956_v50, %v4766_v42  ;;  %v5198_v25 = vadd.f32 %v1605_v55, %v5024_v41 }
 0x1ad   : > { %v3873_v18 = vpop.f32.mrf.mxu0  ;;  %v3839_v40 = vpop.f32.mrf.mxu1 }
 0x1ae   : > { %6010 = vst [vmem:[#allocation69_spill] sm:$0xff] %v5198_v25  ;;  %v5201_v21 = vadd.f32 %v3873_v18, %v4771_v29  ;;  %v5204_v62 = vadd.f32 %v3839_v40, %v5029_v32  ;;  %v6014_v32 = vld [vmem:[#allocation16_spill] sm:$0xff] }
 0x1af   : > { %v1959_v22 = vpop.f32.mrf.mxu0  ;;  %v1608_v43 = vpop.f32.mrf.mxu1 }
 0x1b0   : > { %6011 = vst [vmem:[#allocation70_spill] sm:$0xff] %v5204_v62  ;;  %v5207_v24 = vadd.f32 %v1959_v22, %v4776_v28  ;;  %v5210_v6 = vadd.f32 %v1608_v43, %v5034_v60  ;;  %v6016_v60 = vld [vmem:[#allocation17_spill] sm:$0xff] }
 0x1b1   : > { %v3876_v42 = vpop.f32.mrf.mxu0  ;;  %v3842_v48 = vpop.f32.mrf.mxu1 }
 0x1b2   : > { %6012 = vst [vmem:[#allocation71_spill] sm:$0xff] %v5210_v6  ;;  %v5213_v41 = vadd.f32 %v3876_v42, %v4787_v30  ;;  %v5216_v50 = vadd.f32 %v3842_v48, %v5039_v19  ;;  %v6018_v42 = vld [vmem:[#allocation2_spill] sm:$0xff] }
 0x1b3   : > { %v1972_v29 = vpop.f32.mrf.mxu0  ;;  %v1621_v55 = vpop.f32.mrf.mxu1  ;;  %v6019_v19 = vld [vmem:[#allocation18_spill] sm:$0xff] }
 0x1b4   : > { %6013 = vst [vmem:[#allocation72_spill] sm:$0xff] %v5216_v50  ;;  %v5219_v18 = vadd.f32 %v1972_v29, %v6014_v32  ;;  %v5222_v40 = vadd.f32 %v1621_v55, %v5044_v17  ;;  %v908_v48 = vadd.f32 %v6019_v19, %v6018_v42  ;;  %v6021_v32 = vld [vmem:[#allocation3_spill] sm:$0xff]  ;;  %v6027_v19 = vld [vmem:[#allocation5_spill] sm:$0xff] }
 0x1b5   : > { %v3877_v28 = vpop.f32.mrf.mxu0  ;;  %v3843_v22 = vpop.f32.mrf.mxu1  ;;  %v6022_v17 = vld [vmem:[#allocation19_spill] sm:$0xff] }
 0x1b6   : > { %6015 = vst [vmem:[#allocation16_spill] sm:$0xff] %v5222_v40  ;;  %v5225_v43 = vadd.f32 %v3877_v28, %v6016_v60  ;;  %v5228_v6 = vadd.f32 %v3843_v22, %v5049_v11  ;;  %v900_v55 = vadd.f32 %v6022_v17, %v6021_v32  ;;  %v6024_v22 = vld [vmem:[#allocation4_spill] sm:$0xff] }
 0x1b7   : > { %v1975_v30 = vpop.f32.mrf.mxu0  ;;  %v1624_v50 = vpop.f32.mrf.mxu1  ;;  %v6025_v60 = vld [vmem:[#allocation20_spill] sm:$0xff] }
 0x1b8   : > { %6017 = vst [vmem:[#allocation17_spill] sm:$0xff] %v5228_v6  ;;  %v5233_v62 = vadd.f32 %v1624_v50, %v5054_v7  ;;  %v911_v30 = vadd.f32 %v6025_v60, %v6024_v22 }
 0x1b9   : > { %v3880_v29 = vpop.f32.mrf.mxu0  ;;  %v3846_v40 = vpop.f32.mrf.mxu1 }
 0x1ba   : > { %6020 = vst [vmem:[#allocation2_spill] sm:$0xff] %v5233_v62  ;;  %v5237_v25 = vadd.f32 %v3880_v29, %v908_v48  ;;  %v5240_v28 = vadd.f32 %v3846_v40, %v5059_v61  ;;  %v6028_v62 = vld [vmem:[#allocation21_spill] sm:$0xff] }
 0x1bb   : > { %v1987_v11 = vpop.f32.mrf.mxu0  ;;  %v1637_v6 = vpop.f32.mrf.mxu1  ;;  %v903_v32 = vadd.f32 %v6028_v62, %v6027_v19  ;;  %v6035_v19 = vld [vmem:[#allocation23_spill] sm:$0xff] }
 0x1bc   : > { %6023 = vst [vmem:[#allocation18_spill] sm:$0xff] %v5240_v28  ;;  %v5244_v42 = vadd.f32 %v1987_v11, %v900_v55  ;;  %v5247_v7 = vadd.f32 %v1637_v6, %v5064_v14  ;;  %v6031_v14 = vld [vmem:[#allocation6_spill] sm:$0xff] }
 0x1bd   : > { %v3881_v50 = vpop.f32.mrf.mxu0  ;;  %v3847_v17 = vpop.f32.mrf.mxu1  ;;  %v6032_v6 = vld [vmem:[#allocation22_spill] sm:$0xff] }
 0x1be   : > { %6026 = vst [vmem:[#allocation3_spill] sm:$0xff] %v5247_v7  ;;  %v5251_v48 = vadd.f32 %v3881_v50, %v911_v30  ;;  %v5254_v61 = vadd.f32 %v3847_v17, %v5069_v3  ;;  %v916_v22 = vadd.f32 %v6032_v6, %v6031_v14  ;;  %v6034_v50 = vld [vmem:[#allocation7_spill] sm:$0xff] }
 0x1bf   : > { %v1990_v40 = vpop.f32.mrf.mxu0  ;;  %v1640_v29 = vpop.f32.mrf.mxu1  ;;  %v926_v3 = vadd.f32 %v6035_v19, %v6034_v50 }
 0x1c0   : > { %6029 = vst [vmem:[#allocation19_spill] sm:$0xff] %v5254_v61  ;;  %v5256_v28 = vadd.f32 %v1990_v40, %v903_v32  ;;  %v5259_v55 = vadd.f32 %v1640_v29, %v5074_v13  ;;  %v6037_v40 = vld [vmem:[#allocation8_spill] sm:$0xff] }
 0x1c1   : > { %v3884_v11 = vpop.f32.mrf.mxu0  ;;  %v3850_v60 = vpop.f32.mrf.mxu1  ;;  %v6038_v29 = vld [vmem:[#allocation24_spill] sm:$0xff] }
 0x1c2   : > { %6030 = vst [vmem:[#allocation4_spill] sm:$0xff] %v5259_v55  ;;  %v5264_v62 = vadd.f32 %v3850_v60, %v5079_v4  ;;  %v919_v11 = vadd.f32 %v6038_v29, %v6037_v40  ;;  %v6041_v60 = vld [vmem:[#allocation9_spill] sm:$0xff] }
 0x1c3   : > { %v2003_v30 = vpop.f32.mrf.mxu0  ;;  %v1653_v17 = vpop.f32.mrf.mxu1 }
 0x1c4   : > { %6033 = vst [vmem:[#allocation20_spill] sm:$0xff] %v5264_v62  ;;  %v5268_v61 = vadd.f32 %v2003_v30, %v916_v22  ;;  %v5271_v32 = vadd.f32 %v1653_v17, %v5084_v59  ;;  %v6042_v62 = vld [vmem:[#allocation25_spill] sm:$0xff]  ;;  %v6044_v17 = vld [vmem:[#allocation10_spill] sm:$0xff] }
 0x1c5   : > { %v3885_v13 = vpop.f32.mrf.mxu0  ;;  %v3851_v55 = vpop.f32.mrf.mxu1  ;;  %v939_v50 = vadd.f32 %v6042_v62, %v6041_v60 }
 0x1c6   : > { %6036 = vst [vmem:[#allocation5_spill] sm:$0xff] %v5271_v32  ;;  %v5275_v14 = vadd.f32 %v3885_v13, %v926_v3  ;;  %v5278_v4 = vadd.f32 %v3851_v55, %v5089_v5  ;;  %v6045_v32 = vld [vmem:[#allocation26_spill] sm:$0xff]  ;;  %v6048_v13 = vld [vmem:[#allocation11_spill] sm:$0xff] }
 0x1c7   : > { %v2006_v6 = vpop.f32.mrf.mxu0  ;;  %v1656_v19 = vpop.f32.mrf.mxu1  ;;  %v931_v40 = vadd.f32 %v6045_v32, %v6044_v17 }
 0x1c8   : > { %6039 = vst [vmem:[#allocation21_spill] sm:$0xff] %v5275_v14  ;;  %6040 = vst [vmem:[#allocation6_spill] sm:$0xff] %v5278_v4  ;;  %v5282_v22 = vadd.f32 %v2006_v6, %v919_v11  ;;  %v5285_v59 = vadd.f32 %v1656_v19, %v5094_v1  ;;  %v6049_v4 = vld [vmem:[#allocation27_spill] sm:$0xff]  ;;  %v6052_v19 = vld [vmem:[#allocation12_spill] sm:$0xff] }
 0x1c9   : > { %v3888_v30 = vpop.f32.mrf.mxu0  ;;  %v3854_v29 = vpop.f32.mrf.mxu1  ;;  %v942_v62 = vadd.f32 %v6049_v4, %v6048_v13 }
 0x1ca   : > { %6043 = vst [vmem:[#allocation22_spill] sm:$0xff] %v5285_v59  ;;  %v5289_v3 = vadd.f32 %v3888_v30, %v939_v50  ;;  %v5292_v5 = vadd.f32 %v3854_v29, %v5099_v15  ;;  %v6053_v59 = vld [vmem:[#allocation28_spill] sm:$0xff]  ;;  %v6056_v29 = vld [vmem:[#allocation13_spill] sm:$0xff] }
 0x1cb   : > { %v2018_v55 = vpop.f32.mrf.mxu0  ;;  %v1669_v60 = vpop.f32.mrf.mxu1  ;;  %v934_v32 = vadd.f32 %v6053_v59, %v6052_v19  ;;  %v6061_v59 = vld [vmem:[#allocation30_spill] sm:$0xff] }
 0x1cc   : > { %6046 = vst [vmem:[#allocation7_spill] sm:$0xff] %v5289_v3  ;;  %6047 = vst [vmem:[#allocation23_spill] sm:$0xff] %v5292_v5  ;;  %v5296_v11 = vadd.f32 %v2018_v55, %v931_v40  ;;  %v5299_v1 = vadd.f32 %v1669_v60, %v5104_v44  ;;  %v6057_v5 = vld [vmem:[#allocation29_spill] sm:$0xff]  ;;  %v2552_v55 = vlaneseq }
 0x1cd   : > { %v3889_v6 = vpop.f32.mrf.mxu0  ;;  %v3855_v17 = vpop.f32.mrf.mxu1  ;;  %v955_v4 = vadd.f32 %v6057_v5, %v6056_v29  ;;  %v6064_v5 = vld [vmem:[#allocation32_spill] sm:$0xff]  ;;  %v6065_v29 = vld [vmem:[#allocation15_spill] sm:$0xff] }
 0x1ce   : > { %6050 = vst [vmem:[#allocation8_spill] sm:$0xff] %v5296_v11  ;;  %6051 = vst [vmem:[#allocation24_spill] sm:$0xff] %v5299_v1  ;;  %v5303_v50 = vadd.f32 %v3889_v6, %v942_v62  ;;  %v5306_v15 = vadd.f32 %v3855_v17, %v5109_v33  ;;  %v6060_v1 = vld [vmem:[#allocation14_spill] sm:$0xff] }
 0x1cf   : > { %v2021_v30 = vpop.f32.mrf.mxu0  ;;  %v1672_v13 = vpop.f32.mrf.mxu1  ;;  %v947_v19 = vadd.f32 %v6061_v59, %v6060_v1 }
 0x1d0   : > { %6054 = vst [vmem:[#allocation9_spill] sm:$0xff] %v5303_v50  ;;  %6055 = vst [vmem:[#allocation25_spill] sm:$0xff] %v5306_v15  ;;  %v5310_v40 = vadd.f32 %v2021_v30, %v934_v32  ;;  %v5313_v44 = vadd.f32 %v1672_v13, %v5114_v36  ;;  %v5321_v50 = vshrl.u32 %v2552_v55, 7  ;;  %v6066_v36 = vld [vmem:[#allocation31_spill] sm:$0xff] }
 0x1d1   : > { %v3892_v60 = vpop.f32.mrf.mxu0  ;;  %v3898_v6 = vpop.f32.mrf.mxu1  ;;  %v950_v13 = vadd.f32 %v6066_v36, %v6065_v29  ;;  %v6069_v29 = vld [vmem:[#allocation34_spill] sm:$0xff] }
 0x1d2   : > { %6058 = vst [vmem:[#allocation10_spill] sm:$0xff] %v5310_v40  ;;  %6059 = vst [vmem:[#allocation26_spill] sm:$0xff] %v5313_v44  ;;  %v5317_v62 = vadd.f32 %v3892_v60, %v955_v4  ;;  %v2264_v32 = vadd.f32 %v3898_v6, %v6064_v5  ;;  %vm2554_vm3 = vcmp.lt.s32.totalorder %v5321_v50, 7  ;;  %vm2655_vm4 = vcmp.lt.s32.totalorder %v5321_v50, 6 }
 0x1d3   : > { %v2034_v33 = vpop.f32.mrf.mxu0  ;;  %v2119_v15 = vpop.f32.mrf.mxu1 }
 0x1d4   : > { %6062 = vst [vmem:[#allocation11_spill] sm:$0xff] %v5317_v62  ;;  %v5319_v17 = vadd.f32 %v2034_v33, %v947_v19  ;;  %v2262_v40 = vadd.f32 %v2119_v15, %v4911_v38  ;;  %v2518_v55 = vrot.slane %v2264_v32, 1  ;;  %v6068_v33 = vld [vmem:[#allocation33_spill] sm:$0xff] }
 0x1d5   : > { %v3893_v30 = vpop.f32.mrf.mxu0  ;;  %v3899_v44 = vpop.f32.mrf.mxu1 }
 0x1d6   : > { %6063 = vst [vmem:[#allocation27_spill] sm:$0xff] %v5319_v17  ;;  %v2265_v1 = vadd.f32 %v3899_v44, %v4916_v57  ;;  %v2516_v30 = vrot.slane %v2262_v40, 1 }
 0x1d7   : > { %v2037_v4 = vpop.f32.mrf.mxu0  ;;  %v2122_v59 = vpop.f32.mrf.mxu1 }
 0x1d8   : > { %v5329_v60 = vadd.f32 %v2037_v4, %v950_v13  ;;  %v2519_v19 = vrot.slane %v2265_v1, 1  ;;  %v2263_v17 = vadd.f32 %v2122_v59, %v6068_v33  ;;  %v6070_v4 = vld [vmem:[#allocation35_spill] sm:$0xff]  ;;  %v6071_v33 = vld [vmem:[#allocation66_spill] sm:$0xff] }
 0x1d9   : > { %v3936_v6 = vpop.f32.mrf.mxu0  ;;  %v3902_v5 = vpop.f32.mrf.mxu1 }
 0x1da   : > { %6067 = vst [vmem:[#allocation12_spill] sm:$0xff] %v5329_v60  ;;  %v2584_v38 = vsel %vm2554_vm3, %v2518_v55, %v2519_v19  ;;  %v2517_v57 = vrot.slane %v2263_v17, 1  ;;  %v2268_v36 = vadd.f32 %v3902_v5, %v6069_v29  ;;  %v2482_v32 = vadd.f32 %v3936_v6, %v5102_v2  ;;  %v6072_v2 = vld [vmem:[#allocation67_spill] sm:$0xff]  ;;  %v6073_v5 = vld [vmem:[#allocation36_spill] sm:$0xff] }
 0x1db   : > { %v2337_v15 = vpop.f32.mrf.mxu0  ;;  %v2589_v44 = vadd.f32 %v2584_v38, %v5120_v53  ;;  %v2135_v13 = vpop.f32.mrf.mxu1 }
 0x1dc   : > { %v2585_v1 = vsel %vm2554_vm3, %v2517_v57, %v2518_v55  ;;  %v2586_v40 = vsel %vm2554_vm3, %v2516_v30, %v2517_v57  ;;  %v2266_v59 = vadd.f32 %v2135_v13, %v6070_v4  ;;  %v2480_v60 = vadd.f32 %v2337_v15, %v6071_v33  ;;  %v6074_v4 = vld [vmem:[#allocation37_spill] sm:$0xff] }
 0x1dd   : > { %v3937_v62 = vpop.f32.mrf.mxu0  ;;  %v2587_v17 = vadd.f32 %v2586_v40, %v5126_v39  ;;  %v2588_v53 = vadd.f32 %v2585_v1, %v5138_v26  ;;  %v3903_v38 = vpop.f32.mrf.mxu1  ;;  %v2522_v15 = vrot.slane %v2268_v36, 1  ;;  %v2621_v39 = vrot.slane %v2482_v32, 2 }
 0x1de   : > { %v5352_v6 = vadd.f32 %v3937_v62, %v6072_v2  ;;  %v2520_v55 = vrot.slane %v2266_v59, 1  ;;  %v5355_v30 = vadd.f32 %v3903_v38, %v6073_v5  ;;  %v2619_v1 = vrot.slane %v2480_v60, 2 }
 0x1df   : > { %v2340_v57 = vpop.f32.mrf.mxu0  ;;  %v2138_v29 = vpop.f32.mrf.mxu1 }
 0x1e0   : > { %v5941_v26 = vrot.slane %v5352_v6, 2  ;;  %v2481_v13 = vadd.f32 %v2340_v57, %v5117_v49  ;;  %v2583_v62 = vsel %vm2554_vm3, %v2519_v19, %v2520_v55  ;;  %v2523_v40 = vrot.slane %v5355_v30, 1  ;;  %v5376_v49 = vld [vmem:[%s5938_s2] ss:$0 sm:$0xff] }
 0x1e1   : > { %v2267_v59 = vadd.f32 %v2138_v29, %v6074_v4  ;;  %v3940_v33 = vpop.f32.mrf.mxu0  ;;  %v5365_v38 = vadd.f32 %v2583_v62, %v5132_v56  ;;  %v3906_v19 = vpop.f32.mrf.mxu1  ;;  %v6075_v30 = vld [vmem:[#allocation38_spill] sm:$0xff] }
 0x1e2   : > { %v2685_v36 = vsel %vm2655_vm4, %v2621_v39, %v5941_v26  ;;  %v2620_v60 = vrot.slane %v2481_v13, 2  ;;  %v5379_v32 = vadd.f32 %v3940_v33, %v5123_v0  ;;  %v2580_v56 = vsel %vm2554_vm3, %v2522_v15, %v2523_v40  ;;  %v5390_v13 = vld [vmem:[%s5939_s3] ss:$0 sm:$0xff] }
 0x1e3   : > { %v2690_v2 = vadd.f32 %v2685_v36, %v2589_v44  ;;  %v2521_v5 = vrot.slane %v2267_v59, 1  ;;  %v5384_v57 = vadd.f32 %v3906_v19, %v6075_v30  ;;  %v2353_v29 = vpop.f32.mrf.mxu0  ;;  %v2593_v62 = vadd.f32 %v2580_v56, %v5144_v54  ;;  %v2151_v59 = vpop.f32.mrf.mxu1 }
 0x1e4   : > { %v2686_v0 = vsel %vm2655_vm4, %v2620_v60, %v2621_v39  ;;  %v2687_v4 = vsel %vm2655_vm4, %v2619_v1, %v2620_v60 }
 0x1e5   : > { %v2729_v33 = vmul.f32 %v5376_v49, %v2690_v2  ;;  %v2581_v54 = vsel %vm2554_vm3, %v2521_v5, %v2522_v15  ;;  %v2582_v36 = vsel %vm2554_vm3, %v2520_v55, %v2521_v5  ;;  %v2688_v19 = vadd.f32 %v2687_v4, %v2587_v17  ;;  %v3941_v56 = vpop.f32.mrf.mxu0  ;;  %v3907_v44 = vpop.f32.mrf.mxu1  ;;  %v6076_v15 = vld [vmem:[#allocation39_spill] sm:$0xff]  ;;  %v6077_v5 = vld [vmem:[#allocation40_spill] sm:$0xff] }
 0x1e6   : > { %v5405_v39 = vadd.f32 %v2582_v36, %v5150_v23  ;;  %v5408_v1 = vadd.f32 %v2581_v54, %v5162_v10  ;;  %v2689_v60 = vadd.f32 %v2686_v0, %v2588_v53  ;;  %v5942_v30 = vrot.slane %v5384_v57, 1 }
 0x1e7   : > { %v2768_v2 = vadd.f32 %v5390_v13, %v2729_v33  ;;  %v2727_v26 = vmul.f32 %v5376_v49, %v2688_v19  ;;  %v2270_v11 = vadd.f32 %v2151_v59, %v6076_v15  ;;  %v2484_v55 = vadd.f32 %v2353_v29, %v5129_v45  ;;  %v2356_v17 = vpop.f32.mrf.mxu0  ;;  %v2154_v53 = vpop.f32.mrf.mxu1 }
 0x1e8   : > { %v2728_v23 = vmul.f32 %v5376_v49, %v2689_v60  ;;  %v5418_v4 = vadd.f32 %v3907_v44, %v6077_v5  ;;  %v5421_v10 = vadd.f32 %v3941_v56, %v5135_v34  ;;  %v2485_v0 = vadd.f32 %v2356_v17, %v5141_v63 }
 0x1e9   : > { %vm2800_vm6 = vcmp.gt.f32.partialorder %v2768_v2, 0.0  ;;  %v2832_v33 = vmul.f32 0.1, %v2768_v2  ;;  %v2766_v54 = vadd.f32 %v5390_v13, %v2727_v26  ;;  %v2524_v59 = vrot.slane %v2270_v11, 1  ;;  %v3944_v36 = vpop.f32.mrf.mxu0  ;;  %v3910_v60 = vpop.f32.mrf.mxu1 }
 0x1ea   : > { %v2767_v45 = vadd.f32 %v5390_v13, %v2728_v23  ;;  %v2623_v29 = vrot.slane %v2484_v55, 2  ;;  %v2527_v19 = vrot.slane %v5418_v4, 1  ;;  %v2626_v44 = vrot.slane %v5421_v10, 2 }
 0x1eb   : > { %v2864_v34 = vsel %vm2800_vm6, %v2768_v2, %v2832_v33  ;;  %vm2798_vm7 = vcmp.gt.f32.partialorder %v2766_v54, 0.0  ;;  %v2830_v63 = vmul.f32 0.1, %v2766_v54  ;;  %v2579_v11 = vsel %vm2554_vm3, %v2523_v40, %v2524_v59  ;;  %v2369_v26 = vpop.f32.mrf.mxu0  ;;  %v2167_v17 = vpop.f32.mrf.mxu1 }
 0x1ec   : > { %v3427_v56 = vpack.c.bf16 %v2864_v34, %v2864_v34  ;;  %vm2799_vm8 = vcmp.gt.f32.partialorder %v2767_v45, 0.0  ;;  %v2831_v15 = vmul.f32 0.1, %v2767_v45  ;;  %v5436_v55 = vadd.f32 %v2579_v11, %v5156_v46 }
 0x1ed   : > { %v2862_v23 = vsel %vm2798_vm7, %v2766_v54, %v2830_v63  ;;  %v6078_v5 = vrot.slane %v5352_v6, 2  ;;  %v2577_v40 = vsel %vm2554_vm3, %v5942_v30, %v2527_v19  ;;  %v6079_v4 = vrot.slane %v5379_v32, 2  ;;  %v5452_v33 = vpop.f32.mrf.mxu0  ;;  %v3911_v63 = vpop.f32.mrf.mxu1  ;;  %v6080_v30 = vld [vmem:[#allocation41_spill] sm:$0xff] }
 0x1ee   : > { %3025 = vst.msk [vmem:[%s5431_s29 + $0x8] sm:$0xf] %vm3022_vm5, %v3427_v56  ;;  %v2863_v6 = vsel %vm2799_vm8, %v2767_v45, %v2831_v15  ;;  %v3425_v54 = vpack.c.bf16 %v2862_v23, %v2862_v23  ;;  %v5458_v34 = vadd.f32 %v2577_v40, %v5168_v9  ;;  %v2271_v3 = vadd.f32 %v2154_v53, %v6080_v30  ;;  %v6081_v56 = vld [vmem:[#allocation42_spill] sm:$0xff] }
 0x1ef   : > { %v2684_v2 = vsel %vm2655_vm4, %v6078_v5, %v2623_v29  ;;  %v2681_v46 = vsel %vm2655_vm4, %v6079_v4, %v2626_v44  ;;  %v3426_v11 = vpack.c.bf16 %v2863_v6, %v2863_v6  ;;  %v2624_v14 = vrot.slane %v2485_v0, 2  ;;  %v2372_v7 = vpop.f32.mrf.mxu0  ;;  %v2170_v23 = vpop.f32.mrf.mxu1 }
 0x1f0   : > { %v2691_v59 = vadd.f32 %v2684_v2, %v5365_v38  ;;  %v2694_v5 = vadd.f32 %v2681_v46, %v2593_v62  ;;  %3023 = vst.msk [vmem:[%s5431_s29] sm:$0xf] %vm3022_vm5, %v3425_v54  ;;  %v5465_v45 = vadd.f32 %v3910_v60, %v6081_v56  ;;  %v5468_v15 = vadd.f32 %v3944_v36, %v5147_v37  ;;  %v6082_v38 = vld [vmem:[#allocation43_spill] sm:$0xff] }
 0x1f1   : > { %v5471_v9 = vadd.f32 %v2167_v17, %v6082_v38  ;;  %3024 = vst.msk [vmem:[%s5431_s29 + $0x4] sm:$0xf] %vm3022_vm5, %v3426_v11  ;;  %v2525_v30 = vrot.slane %v2271_v3, 1  ;;  %v6083_v53 = vrot.slane %v5379_v32, 2  ;;  %v2683_v60 = vsel %vm2655_vm4, %v2623_v29, %v2624_v14  ;;  %v3948_v2 = vpop.f32.mrf.mxu0  ;;  %v3914_v46 = vpop.f32.mrf.mxu1 }
 0x1f2   : > { %v2730_v4 = vmul.f32 %v5376_v49, %v2691_v59  ;;  %v2733_v62 = vmul.f32 %v5376_v49, %v2694_v5  ;;  %v2692_v36 = vadd.f32 %v2683_v60, %v5405_v39  ;;  %v2530_v40 = vrot.slane %v5465_v45, 1 }
 0x1f3   : > { %v2682_v0 = vsel %vm2655_vm4, %v2624_v14, %v6083_v53  ;;  %v6084_v32 = vrot.slane %v5384_v57, 1  ;;  %v2629_v54 = vrot.slane %v5468_v15, 2  ;;  %v2528_v14 = vrot.slane %v5471_v9, 1  ;;  %v5493_v29 = vpop.f32.mrf.mxu0  ;;  %v2183_v11 = vpop.f32.mrf.mxu1 }
 0x1f4   : > { %v2769_v37 = vadd.f32 %v5390_v13, %v2730_v4  ;;  %v2693_v17 = vadd.f32 %v2682_v0, %v5408_v1  ;;  %v2772_v3 = vadd.f32 %v5390_v13, %v2733_v62  ;;  %v2731_v59 = vmul.f32 %v5376_v49, %v2692_v36  ;;  %v6085_v36 = vld [vmem:[#allocation44_spill] sm:$0xff] }
 0x1f5   : > { %v2578_v6 = vsel %vm2554_vm3, %v2525_v30, %v6084_v32  ;;  %v2576_v4 = vsel %vm2554_vm3, %v2527_v19, %v2528_v14  ;;  %v5502_v56 = vpop.f32.mrf.mxu0  ;;  %v3915_v30 = vpop.f32.mrf.mxu1  ;;  %v2492_v15 = vadd.f32 %v5493_v29, %v5174_v47 }
 0x1f6   : > { %vm2801_vm9 = vcmp.gt.f32.partialorder %v2769_v37, 0.0  ;;  %v2833_v39 = vmul.f32 0.1, %v2769_v37  ;;  %v5496_v1 = vadd.f32 %v2578_v6, %v5183_v12  ;;  %vm2804_vm10 = vcmp.gt.f32.partialorder %v2772_v3, 0.0 }
 0x1f7   : > { %v2836_v5 = vmul.f32 0.1, %v2772_v3  ;;  %v2732_v57 = vmul.f32 %v5376_v49, %v2693_v17  ;;  %v2770_v9 = vadd.f32 %v5390_v13, %v2731_v59  ;;  %v5506_v62 = vadd.f32 %v2576_v4, %v5177_v51  ;;  %v5511_v19 = vpop.f32.mrf.mxu0 }
 0x1f8   : > { %v2865_v38 = vsel %vm2801_vm9, %v2769_v37, %v2833_v39  ;;  %v2488_v12 = vadd.f32 %v2369_v26, %v5153_v27  ;;  %v2277_v17 = vadd.f32 %v3911_v63, %v6085_v36  ;;  %v5513_v39 = vpop.f32.mrf.mxu1  ;;  %v6086_v26 = vld [vmem:[#allocation68_spill] sm:$0xff] }
 0x1f9   : > { %v3428_v53 = vpack.c.bf16 %v2865_v38, %v2865_v38  ;;  %v2868_v0 = vsel %vm2804_vm10, %v2772_v3, %v2836_v5  ;;  %v2771_v60 = vadd.f32 %v5390_v13, %v2732_v57  ;;  %vm2802_vm11 = vcmp.gt.f32.partialorder %v2770_v9, 0.0  ;;  %v5521_v59 = vpop.f32.mrf.mxu0  ;;  %v6087_v57 = vld [vmem:[#allocation45_spill] sm:$0xff] }
 0x1fa   : > { %v3431_v32 = vpack.c.bf16 %v2868_v0, %v2868_v0  ;;  %v2834_v37 = vmul.f32 0.1, %v2770_v9  ;;  %v2627_v6 = vrot.slane %v2488_v12, 2  ;;  %v2531_v51 = vrot.slane %v2277_v17, 1  ;;  %v5531_v12 = vpop.f32.mrf.mxu1  ;;  %v6088_v17 = vld [vmem:[#allocation46_spill] sm:$0xff] }
 0x1fb   : > { %3026 = vst.msk [vmem:[%s5431_s29 + $0xc] sm:$0xf] %vm3022_vm5, %v3428_v53  ;;  %vm2803_vm12 = vcmp.gt.f32.partialorder %v2771_v60, 0.0  ;;  %v2835_v27 = vmul.f32 0.1, %v2771_v60  ;;  %v5519_v3 = vadd.f32 %v5452_v33, %v6086_v26  ;;  %v2275_v4 = vadd.f32 %v2170_v23, %v6087_v57  ;;  %v5538_v10 = vpop.f32.mrf.mxu0 }
 0x1fc   : > { %3029 = vst.msk [vmem:[%s5431_s29 + $0x18] sm:$0xf] %vm3022_vm5, %v3431_v32  ;;  %v2866_v63 = vsel %vm2802_vm11, %v2770_v9, %v2834_v37  ;;  %v2680_v5 = vsel %vm2655_vm4, %v2626_v44, %v2627_v6  ;;  %v2489_v38 = vadd.f32 %v2372_v7, %v5165_v52  ;;  %v2573_v9 = vsel %vm2554_vm3, %v2530_v40, %v2531_v51  ;;  %v5549_v37 = vpop.f32.mrf.mxu1 }
 0x1fd   : > { %v2867_v53 = vsel %vm2803_vm12, %v2771_v60, %v2835_v27  ;;  %v3429_v33 = vpack.c.bf16 %v2866_v63, %v2866_v63  ;;  %v2695_v0 = vadd.f32 %v2680_v5, %v5436_v55  ;;  %v2600_v44 = vadd.f32 %v2573_v9, %v5189_v31  ;;  %v5551_v6 = vpop.f32.mrf.mxu0 }
 0x1fe   : > { %v3430_v36 = vpack.c.bf16 %v2867_v53, %v2867_v53  ;;  %v2630_v23 = vrot.slane %v5519_v3, 2  ;;  %v2529_v52 = vrot.slane %v2275_v4, 1  ;;  %v2628_v60 = vrot.slane %v2489_v38, 2 }
 0x1ff   : > { %3027 = vst.msk [vmem:[%s5431_s29 + $0x10] sm:$0xf] %vm3022_vm5, %v3429_v33  ;;  %v2734_v7 = vmul.f32 %v5376_v49, %v2695_v0  ;;  %v2280_v55 = vadd.f32 %v3914_v46, %v6088_v17  ;;  %v5547_v32 = vadd.f32 %v3948_v2, %v5171_v20  ;;  %v6089_v2 = vld [vmem:[#allocation47_spill] sm:$0xff]  ;;  %v5590_v33 = vadd.f32 %v5502_v56, %v5180_v35  ;;  %v6091_v56 = vld [vmem:[#allocation49_spill] sm:$0xff] }
 0x200   : > { %3028 = vst.msk [vmem:[%s5431_s29 + $0x14] sm:$0xf] %vm3022_vm5, %v3430_v36  ;;  %v2678_v31 = vsel %vm2655_vm4, %v2629_v54, %v2630_v23  ;;  %v2574_v27 = vsel %vm2554_vm3, %v2529_v52, %v2530_v40  ;;  %v2575_v20 = vsel %vm2554_vm3, %v2528_v14, %v2529_v52  ;;  %v2278_v46 = vadd.f32 %v2183_v11, %v6089_v2  ;;  %v5575_v14 = vpop.f32.mrf.mxu0 }
 0x201   : > { %v2773_v26 = vadd.f32 %v5390_v13, %v2734_v7  ;;  %v2697_v3 = vadd.f32 %v2678_v31, %v5458_v34  ;;  %v2598_v63 = vadd.f32 %v2575_v20, %v5195_v58  ;;  %v2599_v5 = vadd.f32 %v2574_v27, %v5207_v24  ;;  %v5579_v58 = vpop.f32.mrf.mxu1 }
 0x202   : > { %v2679_v45 = vsel %vm2655_vm4, %v2628_v60, %v2629_v54  ;;  %v2534_v57 = vrot.slane %v2280_v55, 1  ;;  %v2633_v40 = vrot.slane %v5547_v32, 2  ;;  %v2532_v4 = vrot.slane %v2278_v46, 1  ;;  %v6090_v54 = vld [vmem:[#allocation48_spill] sm:$0xff] }
 0x203   : > { %vm2805_vm13 = vcmp.gt.f32.partialorder %v2773_v26, 0.0  ;;  %v2837_v11 = vmul.f32 0.1, %v2773_v26  ;;  %v2736_v38 = vmul.f32 %v5376_v49, %v2697_v3  ;;  %v2696_v34 = vadd.f32 %v2679_v45, %v5496_v1  ;;  %v5604_v17 = vpop.f32.mrf.mxu1 }
 0x204   : > { %v2572_v24 = vsel %vm2554_vm3, %v2531_v51, %v2532_v4  ;;  %v5586_v53 = vadd.f32 %v3915_v30, %v6090_v54  ;;  %v2631_v52 = vrot.slane %v2492_v15, 2  ;;  %v2634_v29 = vrot.slane %v5590_v33, 2  ;;  %v5599_v30 = vpop.f32.mrf.mxu0 }
 0x205   : > { %v2869_v0 = vsel %vm2805_vm13, %v2773_v26, %v2837_v11  ;;  %v2775_v9 = vadd.f32 %v5390_v13, %v2736_v38  ;;  %v2735_v1 = vmul.f32 %v5376_v49, %v2696_v34  ;;  %v5595_v36 = vadd.f32 %v2572_v24, %v5201_v21  ;;  %v6092_v38 = vld [vmem:[#allocation50_spill] sm:$0xff] }
 0x206   : > { %v3432_v51 = vpack.c.bf16 %v2869_v0, %v2869_v0  ;;  %v2535_v47 = vrot.slane %v5586_v53, 1  ;;  %v2279_v60 = vadd.f32 %v5513_v39, %v6091_v56  ;;  %v2677_v21 = vsel %vm2655_vm4, %v2630_v23, %v2631_v52  ;;  %v5622_v3 = vpop.f32.mrf.mxu0  ;;  %v6094_v56 = vld [vmem:[#allocation69_spill] sm:$0xff] }
 0x207   : > { %vm2807_vm14 = vcmp.gt.f32.partialorder %v2775_v9, 0.0  ;;  %v2839_v7 = vmul.f32 0.1, %v2775_v9  ;;  %v2774_v35 = vadd.f32 %v5390_v13, %v2735_v1  ;;  %v2674_v32 = vsel %vm2655_vm4, %v2633_v40, %v2634_v29  ;;  %v6093_v1 = vld [vmem:[#allocation51_spill] sm:$0xff] }
 0x208   : > { %3030 = vst.msk [vmem:[%s5431_s29 + $0x1c] sm:$0xf] %vm3022_vm5, %v3432_v51  ;;  %v2570_v55 = vsel %vm2554_vm3, %v2534_v57, %v2535_v47  ;;  %v2493_v31 = vadd.f32 %v5511_v19, %v5186_v16  ;;  %v2698_v20 = vadd.f32 %v2677_v21, %v5506_v62  ;;  %v2701_v46 = vadd.f32 %v2674_v32, %v2600_v44  ;;  %v3922_v19 = vpop.f32.mrf.mxu1  ;;  %v6095_v21 = vld [vmem:[#allocation52_spill] sm:$0xff] }
 0x209   : > { %v2871_v39 = vsel %vm2807_vm14, %v2775_v9, %v2839_v7  ;;  %vm2806_vm15 = vcmp.gt.f32.partialorder %v2774_v35, 0.0  ;;  %v2838_v27 = vmul.f32 0.1, %v2774_v35  ;;  %v5620_v23 = vadd.f32 %v2570_v55, %v5213_v41 }
 0x20a   : > { %v3434_v2 = vpack.c.bf16 %v2871_v39, %v2871_v39  ;;  %v2533_v26 = vrot.slane %v2279_v60, 1  ;;  %v2737_v57 = vmul.f32 %v5376_v49, %v2698_v20  ;;  %v2632_v11 = vrot.slane %v2493_v31, 2 }
 0x20b   : > { %v2870_v45 = vsel %vm2806_vm15, %v2774_v35, %v2838_v27  ;;  %v5627_v16 = vadd.f32 %v5531_v12, %v6092_v38  ;;  %v2740_v41 = vmul.f32 %v5376_v49, %v2701_v46  ;;  %v2498_v34 = vadd.f32 %v5521_v59, %v5192_v8  ;;  %v5648_v8 = vpop.f32.mrf.mxu0  ;;  %v6096_v38 = vld [vmem:[#allocation70_spill] sm:$0xff] }
 0x20c   : > { %3032 = vst.msk [vmem:[%s5431_s29 + $0x24] sm:$0xf] %vm3022_vm5, %v3434_v2  ;;  %v3433_v62 = vpack.c.bf16 %v2870_v45, %v2870_v45  ;;  %v2571_v44 = vsel %vm2554_vm3, %v2532_v4, %v2533_v26  ;;  %v2776_v24 = vadd.f32 %v5390_v13, %v2737_v57  ;;  %v2675_v12 = vsel %vm2655_vm4, %v2632_v11, %v2633_v40  ;;  %v2215_v40 = vpop.f32.mrf.mxu1 }
 0x20d   : > { %v5638_v15 = vadd.f32 %v2571_v44, %v5219_v18  ;;  %v2676_v54 = vsel %vm2655_vm4, %v2631_v52, %v2632_v11  ;;  %v2779_v53 = vadd.f32 %v5390_v13, %v2740_v41  ;;  %v2700_v4 = vadd.f32 %v2675_v12, %v2599_v5  ;;  %v5660_v27 = vpop.f32.mrf.mxu0  ;;  %v6097_v12 = vld [vmem:[#allocation53_spill] sm:$0xff] }
 0x20e   : > { %3031 = vst.msk [vmem:[%s5431_s29 + $0x20] sm:$0xf] %vm3022_vm5, %v3433_v62  ;;  %v2699_v0 = vadd.f32 %v2676_v54, %v2598_v63  ;;  %v2538_v9 = vrot.slane %v5627_v16, 1  ;;  %vm2808_vm0 = vcmp.gt.f32.partialorder %v2776_v24, 0.0  ;;  %v2840_v59 = vmul.f32 0.1, %v2776_v24  ;;  %v3923_v45 = vpop.f32.mrf.mxu1 }
 0x20f   : > { %v2637_v18 = vrot.slane %v2498_v34, 2  ;;  %v2282_v51 = vadd.f32 %v5549_v37, %v6093_v1  ;;  %vm2811_vm1 = vcmp.gt.f32.partialorder %v2779_v53, 0.0  ;;  %v2843_v7 = vmul.f32 0.1, %v2779_v53 }
 0x210   : > { %v2738_v52 = vmul.f32 %v5376_v49, %v2699_v0  ;;  %v2739_v35 = vmul.f32 %v5376_v49, %v2700_v4  ;;  %v2872_v63 = vsel %vm2808_vm0, %v2776_v24, %v2840_v59  ;;  %v2496_v60 = vadd.f32 %v5538_v10, %v6094_v56  ;;  %v6099_v59 = vld [vmem:[#allocation54_spill] sm:$0xff] }
 0x211   : > { %v2536_v5 = vrot.slane %v2282_v51, 1  ;;  %v2285_v55 = vadd.f32 %v5579_v58, %v6095_v21  ;;  %v3435_v32 = vpack.c.bf16 %v2872_v63, %v2872_v63  ;;  %v2875_v31 = vsel %vm2811_vm1, %v2779_v53, %v2843_v7  ;;  %v2218_v53 = vpop.f32.mrf.mxu1  ;;  %v6101_v7 = vld [vmem:[#allocation55_spill] sm:$0xff] }
 0x212   : > { %v2777_v37 = vadd.f32 %v5390_v13, %v2738_v52  ;;  %v2778_v39 = vadd.f32 %v5390_v13, %v2739_v35  ;;  %v3438_v20 = vpack.c.bf16 %v2875_v31, %v2875_v31  ;;  %v2635_v46 = vrot.slane %v2496_v60, 2  ;;  %v6102_v35 = vld [vmem:[#allocation16_spill] sm:$0xff] }
 0x213   : > { %v2569_v2 = vsel %vm2554_vm3, %v2535_v47, %v2536_v5  ;;  %v2539_v26 = vrot.slane %v2285_v55, 1  ;;  %3033 = vst.msk [vmem:[%s5431_s29 + $0x28] sm:$0xf] %vm3022_vm5, %v3435_v32  ;;  %v2499_v16 = vadd.f32 %v5551_v6, %v6096_v38  ;;  %v2283_v54 = vadd.f32 %v5604_v17, %v6097_v12  ;;  %v6098_v6 = vld [vmem:[#allocation71_spill] sm:$0xff]  ;;  %v3926_v32 = vpop.f32.mrf.mxu1 }
 0x214   : > { %vm2809_vm2 = vcmp.gt.f32.partialorder %v2777_v37, 0.0  ;;  %vm2810_vm6 = vcmp.gt.f32.partialorder %v2778_v39, 0.0  ;;  %v2841_v10 = vmul.f32 0.1, %v2777_v37  ;;  %v2842_v58 = vmul.f32 0.1, %v2778_v39 }
 0x215   : > { %3036 = vst.msk [vmem:[%s5431_s29 + $0x34] sm:$0xf] %vm3022_vm5, %v3438_v20  ;;  %v2604_v57 = vadd.f32 %v2569_v2, %v5225_v43  ;;  %v2673_v11 = vsel %vm2655_vm4, %v2634_v29, %v2635_v46  ;;  %v2566_v47 = vsel %vm2554_vm3, %v2538_v9, %v2539_v26  ;;  %v5681_v43 = vpop.f32.mrf.mxu0  ;;  %v2638_v29 = vrot.slane %v2499_v16, 2  ;;  %v2231_v16 = vpop.f32.mrf.mxu1 }
 0x216   : > { %v2873_v62 = vsel %vm2809_vm2, %v2777_v37, %v2841_v10  ;;  %v2874_v41 = vsel %vm2810_vm6, %v2778_v39, %v2842_v58  ;;  %v2702_v44 = vadd.f32 %v2673_v11, %v5595_v36  ;;  %v5679_v34 = vadd.f32 %v2566_v47, %v5237_v25  ;;  %v6100_v36 = vld [vmem:[#allocation72_spill] sm:$0xff] }
 0x217   : > { %v3436_v33 = vpack.c.bf16 %v2873_v62, %v2873_v62  ;;  %v3437_v24 = vpack.c.bf16 %v2874_v41, %v2874_v41  ;;  %v2497_v4 = vadd.f32 %v5575_v14, %v6098_v6  ;;  %v2288_v1 = vadd.f32 %v3922_v19, %v6099_v59  ;;  %v5704_v60 = vpop.f32.mrf.mxu0 }
 0x218   : > { %v2741_v0 = vmul.f32 %v5376_v49, %v2702_v44  ;;  %v5691_v25 = vadd.f32 %v5599_v30, %v6100_v36  ;;  %v2671_v51 = vsel %vm2655_vm4, %v2637_v18, %v2638_v29  ;;  %v2537_v17 = vrot.slane %v2283_v54, 1  ;;  %v3927_v36 = vpop.f32.mrf.mxu1 }
 0x219   : > { %3034 = vst.msk [vmem:[%s5431_s29 + $0x2c] sm:$0xf] %vm3022_vm5, %v3436_v33  ;;  %3035 = vst.msk [vmem:[%s5431_s29 + $0x30] sm:$0xf] %vm3022_vm5, %v3437_v24  ;;  %v2286_v52 = vadd.f32 %v2215_v40, %v6101_v7  ;;  %v2500_v63 = vadd.f32 %v5622_v3, %v6102_v35  ;;  %v2704_v19 = vadd.f32 %v2671_v51, %v5620_v23  ;;  %v2636_v56 = vrot.slane %v2497_v4, 2  ;;  %v5723_v11 = vpop.f32.mrf.mxu0  ;;  %v6105_v33 = vld [vmem:[#allocation57_spill] sm:$0xff] }
 0x21a   : > { %v2780_v14 = vadd.f32 %v5390_v13, %v2741_v0  ;;  %v2542_v30 = vrot.slane %v2288_v1, 1  ;;  %v2567_v21 = vsel %vm2554_vm3, %v2537_v17, %v2538_v9  ;;  %v2568_v18 = vsel %vm2554_vm3, %v2536_v5, %v2537_v17  ;;  %v6107_v0 = vld [vmem:[#allocation58_spill] sm:$0xff] }
 0x21b   : > { %v2641_v55 = vrot.slane %v5691_v25, 2  ;;  %v2540_v40 = vrot.slane %v2286_v52, 1  ;;  %v2743_v31 = vmul.f32 %v5376_v49, %v2704_v19  ;;  %v2605_v23 = vadd.f32 %v2568_v18, %v5244_v42 }
 0x21c   : > { %vm2812_vm7 = vcmp.gt.f32.partialorder %v2780_v14, 0.0  ;;  %v2844_v3 = vmul.f32 0.1, %v2780_v14  ;;  %v2606_v37 = vadd.f32 %v2567_v21, %v5256_v28  ;;  %v2672_v39 = vsel %vm2655_vm4, %v2635_v46, %v2636_v56  ;;  %v6103_v46 = vld [vmem:[#allocation56_spill] sm:$0xff] }
 0x21d   : > { %v2565_v9 = vsel %vm2554_vm3, %v2539_v26, %v2540_v40  ;;  %v2639_v5 = vrot.slane %v2500_v63, 2  ;;  %v2782_v2 = vadd.f32 %v5390_v13, %v2743_v31  ;;  %v2703_v10 = vadd.f32 %v2672_v39, %v5638_v15  ;;  %v6104_v26 = vld [vmem:[#allocation17_spill] sm:$0xff] }
 0x21e   : > { %v2876_v20 = vsel %vm2812_vm7, %v2780_v14, %v2844_v3  ;;  %v5721_v58 = vadd.f32 %v2565_v9, %v5251_v48  ;;  %v5728_v47 = vadd.f32 %v3923_v45, %v6103_v46  ;;  %v5732_v38 = vadd.f32 %v5648_v8, %v6104_v26  ;;  %v6106_v45 = vld [vmem:[#allocation2_spill] sm:$0xff]  ;;  %v6111_v26 = vld [vmem:[#allocation60_spill] sm:$0xff] }
 0x21f   : > { %v3439_v42 = vpack.c.bf16 %v2876_v20, %v2876_v20  ;;  %v2670_v28 = vsel %vm2655_vm4, %v2638_v29, %v2639_v5  ;;  %vm2814_vm8 = vcmp.gt.f32.partialorder %v2782_v2, 0.0  ;;  %v2846_v62 = vmul.f32 0.1, %v2782_v2  ;;  %v6109_v20 = vld [vmem:[#allocation59_spill] sm:$0xff] }
 0x220   : > { %v2742_v15 = vmul.f32 %v5376_v49, %v2703_v10  ;;  %v2705_v48 = vadd.f32 %v2670_v28, %v2604_v57  ;;  %v2543_v41 = vrot.slane %v5728_v47, 1  ;;  %v2642_v44 = vrot.slane %v5732_v38, 2  ;;  %v5747_v57 = vpop.f32.mrf.mxu0  ;;  %v6110_v10 = vld [vmem:[#allocation3_spill] sm:$0xff]  ;;  %v6115_v38 = vld [vmem:[#allocation4_spill] sm:$0xff] }
 0x221   : > { %3037 = vst.msk [vmem:[%s5431_s29 + $0x38] sm:$0xf] %vm3022_vm5, %v3439_v42  ;;  %v2287_v24 = vadd.f32 %v2218_v53, %v6105_v33  ;;  %v2501_v29 = vadd.f32 %v5660_v27, %v6106_v45  ;;  %v2878_v8 = vsel %vm2814_vm8, %v2782_v2, %v2846_v62  ;;  %v5745_v6 = vadd.f32 %v3926_v32, %v6107_v0  ;;  %v6112_v33 = vld [vmem:[#allocation19_spill] sm:$0xff] }
 0x222   : > { %v2781_v12 = vadd.f32 %v5390_v13, %v2742_v15  ;;  %v2744_v54 = vmul.f32 %v5376_v49, %v2705_v48  ;;  %v3441_v4 = vpack.c.bf16 %v2878_v8, %v2878_v8  ;;  %v2667_v53 = vsel %vm2655_vm4, %v2641_v55, %v2642_v44  ;;  %v3964_v19 = vpop.f32.mrf.mxu0 }
 0x223   : > { %v2541_v59 = vrot.slane %v2287_v24, 1  ;;  %v2640_v1 = vrot.slane %v2501_v29, 2  ;;  %v2708_v51 = vadd.f32 %v2667_v53, %v5679_v34  ;;  %v2546_v31 = vrot.slane %v5745_v6, 1 }
 0x224   : > { %vm2813_vm9 = vcmp.gt.f32.partialorder %v2781_v12, 0.0  ;;  %v2845_v27 = vmul.f32 0.1, %v2781_v12  ;;  %v2783_v25 = vadd.f32 %v5390_v13, %v2744_v54  ;;  %3039 = vst.msk [vmem:[%s5431_s29 + $0x40] sm:$0xf] %vm3022_vm5, %v3441_v4  ;;  %v2504_v42 = vadd.f32 %v5704_v60, %v6110_v10 }
 0x225   : > { %v2563_v17 = vsel %vm2554_vm3, %v2541_v59, %v2542_v30  ;;  %v2564_v7 = vsel %vm2554_vm3, %v2540_v40, %v2541_v59  ;;  %v2668_v52 = vsel %vm2655_vm4, %v2640_v1, %v2641_v55  ;;  %v2669_v35 = vsel %vm2655_vm4, %v2639_v5, %v2640_v1  ;;  %v2234_v55 = vpop.f32.mrf.mxu1  ;;  %v6108_v5 = vld [vmem:[#allocation18_spill] sm:$0xff] }
 0x226   : > { %v2877_v63 = vsel %vm2813_vm9, %v2781_v12, %v2845_v27  ;;  %vm2815_vm10 = vcmp.gt.f32.partialorder %v2783_v25, 0.0  ;;  %v2847_v14 = vmul.f32 0.1, %v2783_v25  ;;  %v2747_v34 = vmul.f32 %v5376_v49, %v2708_v51  ;;  %v6113_v12 = vld [vmem:[#allocation21_spill] sm:$0xff] }
 0x227   : > { %v3440_v56 = vpack.c.bf16 %v2877_v63, %v2877_v63  ;;  %v5767_v21 = vadd.f32 %v2564_v7, %v5268_v61  ;;  %v5770_v30 = vadd.f32 %v2563_v17, %v5282_v22  ;;  %v2706_v18 = vadd.f32 %v2669_v35, %v2605_v23  ;;  %v6114_v27 = vld [vmem:[#allocation61_spill] sm:$0xff]  ;;  %v6117_v35 = vld [vmem:[#allocation7_spill] sm:$0xff] }
 0x228   : > { %v2879_v40 = vsel %vm2815_vm10, %v2783_v25, %v2847_v14  ;;  %v2786_v32 = vadd.f32 %v5390_v13, %v2747_v34  ;;  %v2707_v3 = vadd.f32 %v2668_v52, %v2606_v37  ;;  %v2506_v61 = vadd.f32 %v5681_v43, %v6108_v5  ;;  %v2449_v37 = vpop.f32.mrf.mxu0  ;;  %v3930_v43 = vpop.f32.mrf.mxu1  ;;  %v6116_v52 = vld [vmem:[#allocation62_spill] sm:$0xff] }
 0x229   : > { %3038 = vst.msk [vmem:[%s5431_s29 + $0x3c] sm:$0xf] %vm3022_vm5, %v3440_v56  ;;  %v3442_v39 = vpack.c.bf16 %v2879_v40, %v2879_v40  ;;  %v2745_v9 = vmul.f32 %v5376_v49, %v2706_v18  ;;  %v2290_v22 = vadd.f32 %v2231_v16, %v6109_v20  ;;  %v5787_v62 = vadd.f32 %v3927_v36, %v6111_v26  ;;  %v6118_v56 = vld [vmem:[#allocation20_spill] sm:$0xff] }
 0x22a   : > { %vm2818_vm11 = vcmp.gt.f32.partialorder %v2786_v32, 0.0  ;;  %v2850_v23 = vmul.f32 0.1, %v2786_v32  ;;  %v2746_v2 = vmul.f32 %v5376_v49, %v2707_v3  ;;  %v2645_v46 = vrot.slane %v2506_v61, 2  ;;  %v3965_v6 = vpop.f32.mrf.mxu0 }
 0x22b   : > { %3040 = vst.msk [vmem:[%s5431_s29 + $0x44] sm:$0xf] %vm3022_vm5, %v3442_v39  ;;  %v2784_v28 = vadd.f32 %v5390_v13, %v2745_v9  ;;  %v2544_v47 = vrot.slane %v2290_v22, 1  ;;  %v2643_v48 = vrot.slane %v2504_v42, 2  ;;  %v2507_v24 = vadd.f32 %v5723_v11, %v6112_v33  ;;  %v6120_v39 = vld [vmem:[#allocation5_spill] sm:$0xff]  ;;  %v6122_v42 = vld [vmem:[#allocation10_spill] sm:$0xff] }
 0x22c   : > { %v2882_v16 = vsel %vm2818_vm11, %v2786_v32, %v2850_v23  ;;  %v2785_v15 = vadd.f32 %v5390_v13, %v2746_v2  ;;  %v2547_v53 = vrot.slane %v5787_v62, 1  ;;  %v2291_v25 = vadd.f32 %v2234_v55, %v6114_v27  ;;  %v2452_v55 = vpop.f32.mrf.mxu0  ;;  %v6119_v32 = vld [vmem:[#allocation63_spill] sm:$0xff]  ;;  %v6121_v2 = vld [vmem:[#allocation8_spill] sm:$0xff] }
 0x22d   : > { %v3445_v60 = vpack.c.bf16 %v2882_v16, %v2882_v16  ;;  %vm2816_vm12 = vcmp.gt.f32.partialorder %v2784_v28, 0.0  ;;  %v2848_v45 = vmul.f32 0.1, %v2784_v28  ;;  %v2562_v29 = vsel %vm2554_vm3, %v2543_v41, %v2544_v47  ;;  %v2247_v41 = vpop.f32.mrf.mxu1  ;;  %v6123_v16 = vld [vmem:[#allocation64_spill] sm:$0xff] }
 0x22e   : > { %vm2817_vm13 = vcmp.gt.f32.partialorder %v2785_v15, 0.0  ;;  %v2849_v8 = vmul.f32 0.1, %v2785_v15  ;;  %v2611_v54 = vadd.f32 %v2562_v29, %v6113_v12  ;;  %v2666_v0 = vsel %vm2655_vm4, %v2642_v44, %v2643_v48  ;;  %v3968_v62 = vpop.f32.mrf.mxu0  ;;  %v6125_v29 = vld [vmem:[#allocation9_spill] sm:$0xff] }
 0x22f   : > { %3043 = vst.msk [vmem:[%s5431_s29 + $0x50] sm:$0xf] %vm3022_vm5, %v3445_v60  ;;  %v2880_v11 = vsel %vm2816_vm12, %v2784_v28, %v2848_v45  ;;  %v2709_v4 = vadd.f32 %v2666_v0, %v5721_v58  ;;  %v2646_v59 = vrot.slane %v2507_v24, 2  ;;  %v2505_v51 = vadd.f32 %v5747_v57, %v6115_v38  ;;  %v3931_v5 = vpop.f32.mrf.mxu1 }
 0x230   : > { %v2881_v1 = vsel %vm2817_vm13, %v2785_v15, %v2849_v8  ;;  %v3443_v36 = vpack.c.bf16 %v2880_v11, %v2880_v11  ;;  %v2559_v7 = vsel %vm2554_vm3, %v2546_v31, %v2547_v53  ;;  %v5810_v58 = vadd.f32 %v3930_v43, %v6116_v52  ;;  %v2465_v27 = vpop.f32.mrf.mxu0 }
 0x231   : > { %v3444_v44 = vpack.c.bf16 %v2881_v1, %v2881_v1  ;;  %v2748_v17 = vmul.f32 %v5376_v49, %v2709_v4  ;;  %v2614_v63 = vadd.f32 %v2559_v7, %v6117_v35  ;;  %v2545_v14 = vrot.slane %v2291_v25, 1  ;;  %v2250_v24 = vpop.f32.mrf.mxu1  ;;  %v6126_v1 = vld [vmem:[#allocation65_spill] sm:$0xff]  ;;  %v6128_v7 = vld [vmem:[#allocation11_spill] sm:$0xff] }
 0x232   : > { %3041 = vst.msk [vmem:[%s5431_s29 + $0x48] sm:$0xf] %vm3022_vm5, %v3443_v36  ;;  %v2644_v34 = vrot.slane %v2505_v51, 2  ;;  %v5816_v18 = vadd.f32 %v3964_v19, %v6118_v56  ;;  %v2550_v40 = vrot.slane %v5810_v58, 1  ;;  %v2294_v3 = vadd.f32 %v2247_v41, %v6119_v32  ;;  %v6129_v56 = vld [vmem:[#allocation23_spill] sm:$0xff] }
 0x233   : > { %3042 = vst.msk [vmem:[%s5431_s29 + $0x4c] sm:$0xf] %vm3022_vm5, %v3444_v44  ;;  %v2787_v57 = vadd.f32 %v5390_v13, %v2748_v17  ;;  %v2508_v9 = vadd.f32 %v2449_v37, %v6120_v39  ;;  %v2560_v61 = vsel %vm2554_vm3, %v2545_v14, %v2546_v31  ;;  %v2561_v20 = vsel %vm2554_vm3, %v2544_v47, %v2545_v14 }
 0x234   : > { %v2664_v19 = vsel %vm2655_vm4, %v2644_v34, %v2645_v46  ;;  %v2665_v22 = vsel %vm2655_vm4, %v2643_v48, %v2644_v34  ;;  %v2612_v10 = vadd.f32 %v2561_v20, %v6121_v2  ;;  %v2613_v28 = vadd.f32 %v2560_v61, %v6122_v42  ;;  %v6124_v48 = vld [vmem:[#allocation6_spill] sm:$0xff] }
 0x235   : > { %vm2819_vm14 = vcmp.gt.f32.partialorder %v2787_v57, 0.0  ;;  %v2851_v23 = vmul.f32 0.1, %v2787_v57  ;;  %v2710_v37 = vadd.f32 %v2665_v22, %v5767_v21  ;;  %v2711_v26 = vadd.f32 %v2664_v19, %v5770_v30  ;;  %v6130_v22 = vld [vmem:[#allocation27_spill] sm:$0xff] }
 0x236   : > { %v2649_v31 = vrot.slane %v5816_v18, 2  ;;  %v2548_v47 = vrot.slane %v2294_v3, 1  ;;  %v2647_v46 = vrot.slane %v2508_v9, 2  ;;  %v2297_v15 = vadd.f32 %v3931_v5, %v6123_v16 }
 0x237   : > { %v2883_v43 = vsel %vm2819_vm14, %v2787_v57, %v2851_v23  ;;  %v5839_v33 = vadd.f32 %v3965_v6, %v6124_v48  ;;  %v2749_v45 = vmul.f32 %v5376_v49, %v2710_v37  ;;  %v2750_v21 = vmul.f32 %v5376_v49, %v2711_v26  ;;  %v3969_v57 = vpop.f32.mrf.mxu0  ;;  %v6132_v26 = vld [vmem:[#allocation24_spill] sm:$0xff] }
 0x238   : > { %v3446_v60 = vpack.c.bf16 %v2883_v43, %v2883_v43  ;;  %v2558_v30 = vsel %vm2554_vm3, %v2547_v53, %v2548_v47  ;;  %v2663_v12 = vsel %vm2655_vm4, %v2646_v59, %v2647_v46  ;;  %v2551_v0 = vrot.slane %v2297_v15, 1  ;;  %v6127_v59 = vld [vmem:[#allocation22_spill] sm:$0xff] }
 0x239   : > { %v5846_v8 = vadd.f32 %v2558_v30, %v6125_v29  ;;  %v2650_v11 = vrot.slane %v5839_v33, 2  ;;  %v2788_v6 = vadd.f32 %v5390_v13, %v2749_v45  ;;  %v2789_v4 = vadd.f32 %v5390_v13, %v2750_v21  ;;  %v6134_v21 = vld [vmem:[#allocation26_spill] sm:$0xff] }
 0x23a   : > { %3044 = vst.msk [vmem:[%s5431_s29 + $0x54] sm:$0xf] %vm3022_vm5, %v3446_v60  ;;  %v2712_v41 = vadd.f32 %v2663_v12, %v2611_v54  ;;  %v2295_v36 = vadd.f32 %v2250_v24, %v6126_v1  ;;  %v2555_v53 = vsel %vm2554_vm3, %v2550_v40, %v2551_v0  ;;  %v2509_v38 = vadd.f32 %v2452_v55, %v6127_v59 }
 0x23b   : > { %v2660_v25 = vsel %vm2655_vm4, %v2649_v31, %v2650_v11  ;;  %vm2820_vm15 = vcmp.gt.f32.partialorder %v2788_v6, 0.0  ;;  %vm2821_vm0 = vcmp.gt.f32.partialorder %v2789_v4, 0.0  ;;  %v2852_v51 = vmul.f32 0.1, %v2788_v6 }
 0x23c   : > { %v2853_v44 = vmul.f32 0.1, %v2789_v4  ;;  %v2751_v17 = vmul.f32 %v5376_v49, %v2712_v41  ;;  %v2618_v52 = vadd.f32 %v2555_v53, %v6128_v7  ;;  %v2715_v54 = vadd.f32 %v2660_v25, %v2614_v63 }
 0x23d   : > { %v2549_v58 = vrot.slane %v2295_v36, 1  ;;  %v2884_v35 = vsel %vm2820_vm15, %v2788_v6, %v2852_v51  ;;  %v2648_v34 = vrot.slane %v2509_v38, 2  ;;  %v2514_v18 = vadd.f32 %v3968_v62, %v6129_v56 }
 0x23e   : > { %v2885_v14 = vsel %vm2821_vm0, %v2789_v4, %v2853_v44  ;;  %v3447_v32 = vpack.c.bf16 %v2884_v35, %v2884_v35  ;;  %v2790_v3 = vadd.f32 %v5390_v13, %v2751_v17  ;;  %v2754_v39 = vmul.f32 %v5376_v49, %v2715_v54 }
 0x23f   : > { %v3448_v55 = vpack.c.bf16 %v2885_v14, %v2885_v14  ;;  %v2556_v9 = vsel %vm2554_vm3, %v2549_v58, %v2550_v40  ;;  %v2557_v63 = vsel %vm2554_vm3, %v2548_v47, %v2549_v58  ;;  %v2661_v5 = vsel %vm2655_vm4, %v2648_v34, %v2649_v31  ;;  %v6131_v40 = vld [vmem:[#allocation12_spill] sm:$0xff]  ;;  %v2468_v47 = vpop.f32.mrf.mxu0 }
 0x240   : > { %v2662_v61 = vsel %vm2655_vm4, %v2647_v46, %v2648_v34  ;;  %3045 = vst.msk [vmem:[%s5431_s29 + $0x58] sm:$0xf] %vm3022_vm5, %v3447_v32  ;;  %vm2822_vm1 = vcmp.gt.f32.partialorder %v2790_v3, 0.0  ;;  %v2854_v20 = vmul.f32 0.1, %v2790_v3  ;;  %v2793_v19 = vadd.f32 %v5390_v13, %v2754_v39  ;;  %v6133_v46 = vld [vmem:[#allocation25_spill] sm:$0xff] }
 0x241   : > { %3046 = vst.msk [vmem:[%s5431_s29 + $0x5c] sm:$0xf] %vm3022_vm5, %v3448_v55  ;;  %v2616_v23 = vadd.f32 %v2557_v63, %v6130_v22  ;;  %v2617_v2 = vadd.f32 %v2556_v9, %v6131_v40  ;;  %v2713_v42 = vadd.f32 %v2662_v61, %v2612_v10  ;;  %v2714_v37 = vadd.f32 %v2661_v5, %v2613_v28 }
 0x242   : > { %v2512_v31 = vadd.f32 %v2465_v27, %v6132_v26  ;;  %v2886_v62 = vsel %vm2822_vm1, %v2790_v3, %v2854_v20  ;;  %vm2825_vm3 = vcmp.gt.f32.partialorder %v2793_v19, 0.0  ;;  %v2857_v43 = vmul.f32 0.1, %v2793_v19 }
 0x243   : > { %v2515_v16 = vadd.f32 %v3969_v57, %v6133_v46  ;;  %v3449_v15 = vpack.c.bf16 %v2886_v62, %v2886_v62  ;;  %v2752_v48 = vmul.f32 %v5376_v49, %v2713_v42  ;;  %v2753_v33 = vmul.f32 %v5376_v49, %v2714_v37 }
 0x244   : > { %v2651_v24 = vrot.slane %v2512_v31, 2  ;;  %v2889_v60 = vsel %vm2825_vm3, %v2793_v19, %v2857_v43  ;;  %v2653_v45 = vrot.slane %v2514_v18, 2  ;;  %v2513_v28 = vadd.f32 %v2468_v47, %v6134_v21 }
 0x245   : > { %v2654_v10 = vrot.slane %v2515_v16, 2  ;;  %3047 = vst.msk [vmem:[%s5431_s29 + $0x60] sm:$0xf] %vm3022_vm5, %v3449_v15  ;;  %v3452_v30 = vpack.c.bf16 %v2889_v60, %v2889_v60  ;;  %v2791_v29 = vadd.f32 %v5390_v13, %v2752_v48  ;;  %v2792_v12 = vadd.f32 %v5390_v13, %v2753_v33 }
 0x246   : > { %v2659_v0 = vsel %vm2655_vm4, %v2650_v11, %v2651_v24  ;;  %v2652_v41 = vrot.slane %v2513_v28, 2 }
 0x247   : > { %v2716_v6 = vadd.f32 %v2659_v0, %v5846_v8  ;;  %v2656_v4 = vsel %vm2655_vm4, %v2653_v45, %v2654_v10  ;;  %3050 = vst.msk [vmem:[%s5431_s29 + $0x6c] sm:$0xf] %vm3022_vm5, %v3452_v30  ;;  %vm2823_vm2 = vcmp.gt.f32.partialorder %v2791_v29, 0.0  ;;  %vm2824_vm6 = vcmp.gt.f32.partialorder %v2792_v12, 0.0 }
 0x248   : > { %v2855_v1 = vmul.f32 0.1, %v2791_v29  ;;  %v2856_v36 = vmul.f32 0.1, %v2792_v12  ;;  %v2719_v53 = vadd.f32 %v2656_v4, %v2618_v52  ;;  %v2657_v11 = vsel %vm2655_vm4, %v2652_v41, %v2653_v45 }
 0x249   : > { %v2755_v27 = vmul.f32 %v5376_v49, %v2716_v6  ;;  %v2658_v8 = vsel %vm2655_vm4, %v2651_v24, %v2652_v41  ;;  %v2718_v51 = vadd.f32 %v2657_v11, %v2617_v2 }
 0x24a   : > { %v2887_v25 = vsel %vm2823_vm2, %v2791_v29, %v2855_v1  ;;  %v2888_v59 = vsel %vm2824_vm6, %v2792_v12, %v2856_v36  ;;  %v2717_v38 = vadd.f32 %v2658_v8, %v2616_v23  ;;  %v2758_v54 = vmul.f32 %v5376_v49, %v2719_v53 }
 0x24b   : > { %v3450_v44 = vpack.c.bf16 %v2887_v25, %v2887_v25  ;;  %v3451_v17 = vpack.c.bf16 %v2888_v59, %v2888_v59  ;;  %v2794_v7 = vadd.f32 %v5390_v13, %v2755_v27  ;;  %v2757_v52 = vmul.f32 %v5376_v49, %v2718_v51 }
 0x24c   : > { %v2756_v58 = vmul.f32 %v5376_v49, %v2717_v38  ;;  %v2797_v35 = vadd.f32 %v5390_v13, %v2758_v54 }
 0x24d   : > { %3048 = vst.msk [vmem:[%s5431_s29 + $0x64] sm:$0xf] %vm3022_vm5, %v3450_v44  ;;  %3049 = vst.msk [vmem:[%s5431_s29 + $0x68] sm:$0xf] %vm3022_vm5, %v3451_v17  ;;  %vm2826_vm4 = vcmp.gt.f32.partialorder %v2794_v7, 0.0  ;;  %v2796_v34 = vadd.f32 %v5390_v13, %v2757_v52 }
 0x24e   : > { %v2858_v50 = vmul.f32 0.1, %v2794_v7  ;;  %v2795_v14 = vadd.f32 %v5390_v13, %v2756_v58  ;;  %vm2829_vm7 = vcmp.gt.f32.partialorder %v2797_v35, 0.0  ;;  %v2861_v18 = vmul.f32 0.1, %v2797_v35 }
 0x24f   : > { %vm2828_vm9 = vcmp.gt.f32.partialorder %v2796_v34, 0.0  ;;  %v2860_v55 = vmul.f32 0.1, %v2796_v34 }
 0x250   : > { %v2890_v56 = vsel %vm2826_vm4, %v2794_v7, %v2858_v50  ;;  %vm2827_vm8 = vcmp.gt.f32.partialorder %v2795_v14, 0.0  ;;  %v2859_v57 = vmul.f32 0.1, %v2795_v14  ;;  %v2893_v32 = vsel %vm2829_vm7, %v2797_v35, %v2861_v18 }
 0x251   : > { %v3453_v49 = vpack.c.bf16 %v2890_v56, %v2890_v56  ;;  %v3456_v3 = vpack.c.bf16 %v2893_v32, %v2893_v32  ;;  %v2892_v9 = vsel %vm2828_vm9, %v2796_v34, %v2860_v55 }
 0x252   : > { %v2891_v39 = vsel %vm2827_vm8, %v2795_v14, %v2859_v57  ;;  %v3455_v13 = vpack.c.bf16 %v2892_v9, %v2892_v9 }
 0x253   : > { %3051 = vst.msk [vmem:[%s5431_s29 + $0x70] sm:$0xf] %vm3022_vm5, %v3453_v49  ;;  %v3454_v63 = vpack.c.bf16 %v2891_v39, %v2891_v39  ;;  %3054 = vst.msk [vmem:[%s5431_s29 + $0x7c] sm:$0xf] %vm3022_vm5, %v3456_v3 }
 0x254   : > { %3053 = vst.msk [vmem:[%s5431_s29 + $0x78] sm:$0xf] %vm3022_vm5, %v3455_v13 }
 0x255   : > { %3052 = vst.msk [vmem:[%s5431_s29 + $0x74] sm:$0xf] %vm3022_vm5, %v3454_v63 }
 0x256 PF: > { %s14_s19 = sadd.s32 1, %s4106_s19   ;;  %s6135_s15 = smov %s4098_s17 }
 0x257   : > { %p11_p7 = scmp.ge.s32.totalorder %s14_s19, 34   ;;  %s6136_s16 = smov %s4102_s18 }
 0x258   : > { %s6137_s17 = smov %s6140_s20  ;;  %s6138_s18 = smov %s6144_s21 }
 0x259   :  { %13 = sbr.rel (!%p11_p7) target bundleno = 3 (0x3), region = 77 }

</bundles_post_ra>
